<compile_context>
chip_gen: v7x
topology: tpu7x:2x2x1
jax: 0.10.0
libtpu: 0.0.40
codegen_flags: <defaults>
</compile_context>

<pallas_src>
import functools

import jax
import jax.numpy as jnp
from jax import lax
from jax.experimental import pallas as pl
from jax.experimental.pallas import tpu as pltpu

LANE = 128  # lane width; every gate block / output block is padded to this


def gru_tagger_kernel(tok_ref,    # (seq,) int32      SMEM  token ids
                      emb_ref,    # (V, LANE)         VMEM  padded embedding table
                      wi_ref,     # (LANE, 3*LANE)    VMEM  packed input weights  (r|z|n)
                      wh_ref,     # (LANE, 3*LANE)    VMEM  packed hidden weights (r|z|n)
                      bi_ref,     # (1, 3*LANE)       VMEM  (b_ir+b_hr | b_iz+b_hz | b_in)
                      bhn_ref,    # (1, LANE)         VMEM  b_hn (stays inside r*(...))
                      wlin_ref,   # (LANE, LANE)      VMEM  padded linear weight
                      blin_ref,   # (1, LANE)         VMEM  padded linear bias (-1e30 pads)
                      h0_ref,     # (1, LANE)         VMEM  padded initial hidden
                      out_ref,    # (seq, LANE)       VMEM  softmax probs (lane-dense)
                      hout_ref,   # (1, LANE)         VMEM  final hidden
                      x_s,        # (seq, LANE)       scratch: gathered embeddings
                      gi_s,       # (seq, 3*LANE)     scratch: input-path gates
                      gru_s):     # (seq, LANE)       scratch: per-step hidden states
    seq = out_ref.shape[0]

    # --- 1) embedding gather (ids from SMEM, rows from the VMEM-resident table) ---
    for t in range(seq):  # static, tiny trip count
        x_s[pl.ds(t, 1), :] = emb_ref[pl.ds(tok_ref[t], 1), :]

    # --- 2) input-path gates for ALL timesteps in one MXU call ---
    gi_s[...] = jnp.dot(x_s[...], wi_ref[...],
                        preferred_element_type=jnp.float32) + bi_ref[...]

    # --- 3) recurrence: one fused hidden-path matmul per step ---
    def step(t, h):
        gi = gi_s[pl.ds(t, 1), :]                                    # (1, 3*LANE)
        gh = jnp.dot(h, wh_ref[...], preferred_element_type=jnp.float32)
        r = jax.nn.sigmoid(gi[:, 0:LANE] + gh[:, 0:LANE])
        z = jax.nn.sigmoid(gi[:, LANE:2 * LANE] + gh[:, LANE:2 * LANE])
        n = jnp.tanh(gi[:, 2 * LANE:3 * LANE]
                     + r * (gh[:, 2 * LANE:3 * LANE] + bhn_ref[...]))
        h_new = n + z * (h - n)                                      # == (1-z)*n + z*h
        gru_s[pl.ds(t, 1), :] = h_new
        return h_new

    h_final = lax.fori_loop(0, seq, step, h0_ref[...], unroll=True)
    hout_ref[...] = h_final

    # --- 4) Linear + Softmax over the whole sequence, lane-dense ---
    logits = jnp.dot(gru_s[...], wlin_ref[...],
                     preferred_element_type=jnp.float32) + blin_ref[...]
    m = jnp.max(logits, axis=-1, keepdims=True)
    e = jnp.exp(logits - m)                  # pad lanes: exp(-1e30 - m) == 0
    s = jnp.sum(e, axis=-1, keepdims=True)
    inv = pl.reciprocal(s, approx=True)
    inv = inv * (2.0 - s * inv)              # one Newton step restores f32 accuracy
    out_ref[...] = e * inv


def prepare_packed_params(params):
    """One-time packing of PyTorch-layout params into lane-padded kernel operands."""
    emb = params["embedding"].astype(jnp.float32)
    V, H = emb.shape
    T = params["lin_w"].shape[0]
    assert H <= LANE and T <= LANE
    W_ih = params["gru_w_ih"].astype(jnp.float32)   # (3H, H), gate order r, z, n
    W_hh = params["gru_w_hh"].astype(jnp.float32)
    b_ih = params["gru_b_ih"].astype(jnp.float32)
    b_hh = params["gru_b_hh"].astype(jnp.float32)

    wi = jnp.zeros((LANE, 3 * LANE), jnp.float32)
    wh = jnp.zeros((LANE, 3 * LANE), jnp.float32)
    for g in range(3):
        wi = wi.at[:H, g * LANE:g * LANE + H].set(W_ih[g * H:(g + 1) * H, :].T)
        wh = wh.at[:H, g * LANE:g * LANE + H].set(W_hh[g * H:(g + 1) * H, :].T)

    bi = jnp.zeros((1, 3 * LANE), jnp.float32)
    bi = bi.at[0, 0 * LANE:0 * LANE + H].set(b_ih[0:H] + b_hh[0:H])            # r
    bi = bi.at[0, 1 * LANE:1 * LANE + H].set(b_ih[H:2 * H] + b_hh[H:2 * H])    # z
    bi = bi.at[0, 2 * LANE:2 * LANE + H].set(b_ih[2 * H:3 * H])                # n (input side)
    bhn = jnp.zeros((1, LANE), jnp.float32).at[0, :H].set(b_hh[2 * H:3 * H])   # n (hidden side)

    emb_p = jnp.zeros((V, LANE), jnp.float32).at[:, :H].set(emb)
    wlin = jnp.zeros((LANE, LANE), jnp.float32).at[:H, :T].set(params["lin_w"].T)
    blin = jnp.full((1, LANE), -1e30, jnp.float32).at[0, :T].set(params["lin_b"])

    return dict(emb=emb_p, wi=wi, wh=wh, bi=bi, bhn=bhn, wlin=wlin, blin=blin)


@functools.partial(jax.jit, static_argnames=("hidden_size", "tag_size"))
def gru_pos_tagger_forward(token_ids, hidden, packed, hidden_size, tag_size):
    """Mirrors GRU_POS_Tagger.forward(input, hidden).

    token_ids: (seq,) int32; hidden: (1, 1, H) float32
    returns (output (1, seq, T), hidden (1, 1, H)).
    """
    seq = token_ids.shape[0]
    h0 = jnp.zeros((1, LANE), jnp.float32).at[0, :hidden_size].set(
        hidden.reshape(-1).astype(jnp.float32))

    smem = pl.BlockSpec(memory_space=pltpu.MemorySpace.SMEM)
    vmem = pl.BlockSpec(memory_space=pltpu.MemorySpace.VMEM)

    out_full, h_final = pl.pallas_call(
        gru_tagger_kernel,
        out_shape=(jax.ShapeDtypeStruct((seq, LANE), jnp.float32),
                   jax.ShapeDtypeStruct((1, LANE), jnp.float32)),
        in_specs=[smem] + [vmem] * 8,
        out_specs=(vmem, vmem),
        scratch_shapes=[pltpu.VMEM((seq, LANE), jnp.float32),
                        pltpu.VMEM((seq, 3 * LANE), jnp.float32),
                        pltpu.VMEM((seq, LANE), jnp.float32)],
    )(token_ids.astype(jnp.int32), packed["emb"], packed["wi"], packed["wh"],
      packed["bi"], packed["bhn"], packed["wlin"], packed["blin"], h0)

    out = out_full[:, :tag_size][None, :, :]
    h_out = h_final[:, :hidden_size].reshape(1, 1, hidden_size)
    return out, h_out


def reference_forward(token_ids, hidden, params):
    """Pure-JAX reference with identical PyTorch GRU semantics."""
    x = jnp.take(params["embedding"], token_ids, axis=0)
    H = x.shape[1]
    W_ih, W_hh = params["gru_w_ih"], params["gru_w_hh"]
    b_ih, b_hh = params["gru_b_ih"], params["gru_b_hh"]
    h = hidden.reshape(1, H)
    outs = []
    for t in range(x.shape[0]):
        xt = x[t:t + 1]
        gi = xt @ W_ih.T + b_ih
        gh = h @ W_hh.T + b_hh
        r = jax.nn.sigmoid(gi[:, :H] + gh[:, :H])
        z = jax.nn.sigmoid(gi[:, H:2 * H] + gh[:, H:2 * H])
        n = jnp.tanh(gi[:, 2 * H:] + r * gh[:, 2 * H:])
        h = (1.0 - z) * n + z * h
        outs.append(h)
    o = jnp.concatenate(outs, axis=0)
    logits = o @ params["lin_w"].T + params["lin_b"]
    probs = jax.nn.softmax(logits, axis=-1)
    return probs[None], h.reshape(1, 1, H)


def init_params(key, vocab_size, hidden_size, tag_size):
    ks = jax.random.split(key, 7)
    s = 0.1
    return {
        "embedding": s * jax.random.normal(ks[0], (vocab_size, hidden_size), jnp.float32),
        "gru_w_ih":  s * jax.random.normal(ks[1], (3 * hidden_size, hidden_size), jnp.float32),
        "gru_w_hh":  s * jax.random.normal(ks[2], (3 * hidden_size, hidden_size), jnp.float32),
        "gru_b_ih":  s * jax.random.normal(ks[3], (3 * hidden_size,), jnp.float32),
        "gru_b_hh":  s * jax.random.normal(ks[4], (3 * hidden_size,), jnp.float32),
        "lin_w":     s * jax.random.normal(ks[5], (tag_size, hidden_size), jnp.float32),
        "lin_b":     s * jax.random.normal(ks[6], (tag_size,), jnp.float32),
    }


if __name__ == "__main__":
    vocab_size, hidden_size, tag_size, seq_len = 16, 32, 8, 8

    key = jax.random.PRNGKey(0)
    k_params, k_tokens = jax.random.split(key)
    params = init_params(k_params, vocab_size, hidden_size, tag_size)
    token_ids = jax.random.randint(k_tokens, (seq_len,), 0, vocab_size, dtype=jnp.int32)
    hidden0 = jnp.zeros((1, 1, hidden_size), jnp.float32)   # == initHidden()

    packed = prepare_packed_params(params)                  # one-time packing

    out, h_out = gru_pos_tagger_forward(token_ids, hidden0, packed,
                                        hidden_size=hidden_size, tag_size=tag_size)
    out = jax.block_until_ready(out)
    h_out = jax.block_until_ready(h_out)

    ref_out, ref_h = reference_forward(token_ids, hidden0, params)
    assert out.shape == (1, seq_len, tag_size)
    assert h_out.shape == (1, 1, hidden_size)
    assert jnp.allclose(out, ref_out, atol=1e-5, rtol=1e-5)
    assert jnp.allclose(h_out, ref_h, atol=1e-5, rtol=1e-5)

    print("KERNEL_OK")
</pallas_src>

<mosaic_0001>
module attributes {stable_mosaic.version = 11 : i64} {
  func.func @gru_tagger_kernel(%arg0: memref<8xi32, #tpu.memory_space<smem>>, %arg1: memref<16x128xf32, #tpu.memory_space<vmem>>, %arg2: memref<128x384xf32, #tpu.memory_space<vmem>>, %arg3: memref<128x384xf32, #tpu.memory_space<vmem>>, %arg4: memref<1x384xf32, #tpu.memory_space<vmem>>, %arg5: memref<1x128xf32, #tpu.memory_space<vmem>>, %arg6: memref<128x128xf32, #tpu.memory_space<vmem>>, %arg7: memref<1x128xf32, #tpu.memory_space<vmem>>, %arg8: memref<1x128xf32, #tpu.memory_space<vmem>>, %arg9: memref<8x128xf32, #tpu.memory_space<vmem>>, %arg10: memref<1x128xf32, #tpu.memory_space<vmem>>, %arg11: memref<8x128xf32, #tpu.memory_space<vmem>>, %arg12: memref<8x384xf32, #tpu.memory_space<vmem>>, %arg13: memref<8x128xf32, #tpu.memory_space<vmem>>) attributes {dimension_semantics = [], scalar_prefetch = 0 : i64, scratch_operands = 3 : i64, tpu.core_type = #tpu.core_type<tc>} {
    %c0 = arith.constant 0 : index
    %0 = memref.load %arg0[%c0] : memref<8xi32, #tpu.memory_space<smem>>
    %1 = arith.index_cast %0 : i32 to index
    %c0_0 = arith.constant 0 : index
    %2 = vector.load %arg1[%1, %c0_0] : memref<16x128xf32, #tpu.memory_space<vmem>>, vector<1x128xf32>
    %c0_1 = arith.constant 0 : index
    %c0_2 = arith.constant 0 : index
    %3 = vector.load %arg11[%c0_1, %c0_2] : memref<8x128xf32, #tpu.memory_space<vmem>>, vector<1x128xf32>
    tpu.vector_store %arg11[%c0_1, %c0_2], %2 {strides = array<i32>} : memref<8x128xf32, #tpu.memory_space<vmem>>, vector<1x128xf32>,
    %c1 = arith.constant 1 : index
    %4 = memref.load %arg0[%c1] : memref<8xi32, #tpu.memory_space<smem>>
    %5 = arith.index_cast %4 : i32 to index
    %c0_3 = arith.constant 0 : index
    %6 = vector.load %arg1[%5, %c0_3] : memref<16x128xf32, #tpu.memory_space<vmem>>, vector<1x128xf32>
    %c1_4 = arith.constant 1 : index
    %c0_5 = arith.constant 0 : index
    %7 = vector.load %arg11[%c1_4, %c0_5] : memref<8x128xf32, #tpu.memory_space<vmem>>, vector<1x128xf32>
    tpu.vector_store %arg11[%c1_4, %c0_5], %6 {strides = array<i32>} : memref<8x128xf32, #tpu.memory_space<vmem>>, vector<1x128xf32>,
    %c2 = arith.constant 2 : index
    %8 = memref.load %arg0[%c2] : memref<8xi32, #tpu.memory_space<smem>>
    %9 = arith.index_cast %8 : i32 to index
    %c0_6 = arith.constant 0 : index
    %10 = vector.load %arg1[%9, %c0_6] : memref<16x128xf32, #tpu.memory_space<vmem>>, vector<1x128xf32>
    %c2_7 = arith.constant 2 : index
    %c0_8 = arith.constant 0 : index
    %11 = vector.load %arg11[%c2_7, %c0_8] : memref<8x128xf32, #tpu.memory_space<vmem>>, vector<1x128xf32>
    tpu.vector_store %arg11[%c2_7, %c0_8], %10 {strides = array<i32>} : memref<8x128xf32, #tpu.memory_space<vmem>>, vector<1x128xf32>,
    %c3 = arith.constant 3 : index
    %12 = memref.load %arg0[%c3] : memref<8xi32, #tpu.memory_space<smem>>
    %13 = arith.index_cast %12 : i32 to index
    %c0_9 = arith.constant 0 : index
    %14 = vector.load %arg1[%13, %c0_9] : memref<16x128xf32, #tpu.memory_space<vmem>>, vector<1x128xf32>
    %c3_10 = arith.constant 3 : index
    %c0_11 = arith.constant 0 : index
    %15 = vector.load %arg11[%c3_10, %c0_11] : memref<8x128xf32, #tpu.memory_space<vmem>>, vector<1x128xf32>
    tpu.vector_store %arg11[%c3_10, %c0_11], %14 {strides = array<i32>} : memref<8x128xf32, #tpu.memory_space<vmem>>, vector<1x128xf32>,
    %c4 = arith.constant 4 : index
    %16 = memref.load %arg0[%c4] : memref<8xi32, #tpu.memory_space<smem>>
    %17 = arith.index_cast %16 : i32 to index
    %c0_12 = arith.constant 0 : index
    %18 = vector.load %arg1[%17, %c0_12] : memref<16x128xf32, #tpu.memory_space<vmem>>, vector<1x128xf32>
    %c4_13 = arith.constant 4 : index
    %c0_14 = arith.constant 0 : index
    %19 = vector.load %arg11[%c4_13, %c0_14] : memref<8x128xf32, #tpu.memory_space<vmem>>, vector<1x128xf32>
    tpu.vector_store %arg11[%c4_13, %c0_14], %18 {strides = array<i32>} : memref<8x128xf32, #tpu.memory_space<vmem>>, vector<1x128xf32>,
    %c5 = arith.constant 5 : index
    %20 = memref.load %arg0[%c5] : memref<8xi32, #tpu.memory_space<smem>>
    %21 = arith.index_cast %20 : i32 to index
    %c0_15 = arith.constant 0 : index
    %22 = vector.load %arg1[%21, %c0_15] : memref<16x128xf32, #tpu.memory_space<vmem>>, vector<1x128xf32>
    %c5_16 = arith.constant 5 : index
    %c0_17 = arith.constant 0 : index
    %23 = vector.load %arg11[%c5_16, %c0_17] : memref<8x128xf32, #tpu.memory_space<vmem>>, vector<1x128xf32>
    tpu.vector_store %arg11[%c5_16, %c0_17], %22 {strides = array<i32>} : memref<8x128xf32, #tpu.memory_space<vmem>>, vector<1x128xf32>,
    %c6 = arith.constant 6 : index
    %24 = memref.load %arg0[%c6] : memref<8xi32, #tpu.memory_space<smem>>
    %25 = arith.index_cast %24 : i32 to index
    %c0_18 = arith.constant 0 : index
    %26 = vector.load %arg1[%25, %c0_18] : memref<16x128xf32, #tpu.memory_space<vmem>>, vector<1x128xf32>
    %c6_19 = arith.constant 6 : index
    %c0_20 = arith.constant 0 : index
    %27 = vector.load %arg11[%c6_19, %c0_20] : memref<8x128xf32, #tpu.memory_space<vmem>>, vector<1x128xf32>
    tpu.vector_store %arg11[%c6_19, %c0_20], %26 {strides = array<i32>} : memref<8x128xf32, #tpu.memory_space<vmem>>, vector<1x128xf32>,
    %c7 = arith.constant 7 : index
    %28 = memref.load %arg0[%c7] : memref<8xi32, #tpu.memory_space<smem>>
    %29 = arith.index_cast %28 : i32 to index
    %c0_21 = arith.constant 0 : index
    %30 = vector.load %arg1[%29, %c0_21] : memref<16x128xf32, #tpu.memory_space<vmem>>, vector<1x128xf32>
    %c7_22 = arith.constant 7 : index
    %c0_23 = arith.constant 0 : index
    %31 = vector.load %arg11[%c7_22, %c0_23] : memref<8x128xf32, #tpu.memory_space<vmem>>, vector<1x128xf32>
    tpu.vector_store %arg11[%c7_22, %c0_23], %30 {strides = array<i32>} : memref<8x128xf32, #tpu.memory_space<vmem>>, vector<1x128xf32>,
    %c0_24 = arith.constant 0 : index
    %c0_25 = arith.constant 0 : index
    %32 = vector.load %arg11[%c0_24, %c0_25] : memref<8x128xf32, #tpu.memory_space<vmem>>, vector<8x128xf32>
    %c0_26 = arith.constant 0 : index
    %c0_27 = arith.constant 0 : index
    %33 = vector.load %arg2[%c0_26, %c0_27] : memref<128x384xf32, #tpu.memory_space<vmem>>, vector<128x384xf32>
    %cst = arith.constant dense<0.000000e+00> : vector<8x384xf32>
    %34 = tpu.matmul %32, %33, %cst {dimension_numbers = #tpu.dot_dimension_numbers<[1], [0], [0], [1], [0, 0, 1, 1], [], []>} : vector<8x128xf32>, vector<128x384xf32>, vector<8x384xf32> -> vector<8x384xf32>
    %c0_28 = arith.constant 0 : index
    %c0_29 = arith.constant 0 : index
    %35 = vector.load %arg4[%c0_28, %c0_29] : memref<1x384xf32, #tpu.memory_space<vmem>>, vector<1x384xf32>
    %36 = vector.broadcast %35 : vector<1x384xf32> to vector<8x384xf32>
    %37 = arith.addf %34, %36 : vector<8x384xf32>
    %c0_30 = arith.constant 0 : index
    %c0_31 = arith.constant 0 : index
    %38 = vector.load %arg12[%c0_30, %c0_31] : memref<8x384xf32, #tpu.memory_space<vmem>>, vector<8x384xf32>
    tpu.vector_store %arg12[%c0_30, %c0_31], %37 {strides = array<i32>} : memref<8x384xf32, #tpu.memory_space<vmem>>, vector<8x384xf32>,
    %c0_32 = arith.constant 0 : index
    %c0_33 = arith.constant 0 : index
    %39 = vector.load %arg8[%c0_32, %c0_33] : memref<1x128xf32, #tpu.memory_space<vmem>>, vector<1x128xf32>
    %c0_i32 = arith.constant 0 : i32
    %40 = arith.index_cast %c0_i32 : i32 to index
    %c0_34 = arith.constant 0 : index
    %41 = vector.load %arg12[%40, %c0_34] : memref<8x384xf32, #tpu.memory_space<vmem>>, vector<1x384xf32>
    %c0_35 = arith.constant 0 : index
    %c0_36 = arith.constant 0 : index
    %42 = vector.load %arg3[%c0_35, %c0_36] : memref<128x384xf32, #tpu.memory_space<vmem>>, vector<128x384xf32>
    %cst_37 = arith.constant dense<0.000000e+00> : vector<1x384xf32>
    %43 = tpu.matmul %39, %42, %cst_37 {dimension_numbers = #tpu.dot_dimension_numbers<[1], [0], [0], [1], [0, 0, 1, 1], [], []>} : vector<1x128xf32>, vector<128x384xf32>, vector<1x384xf32> -> vector<1x384xf32>
    %44 = vector.extract_strided_slice %41 {offsets = [0, 0], sizes = [1, 128], strides = [1, 1]} : vector<1x384xf32> to vector<1x128xf32>
    %45 = vector.extract_strided_slice %43 {offsets = [0, 0], sizes = [1, 128], strides = [1, 1]} : vector<1x384xf32> to vector<1x128xf32>
    %46 = arith.addf %44, %45 : vector<1x128xf32>
    %47 = arith.negf %46 : vector<1x128xf32>
    %48 = math.exp %47 : vector<1x128xf32>
    %cst_38 = arith.constant 1.000000e+00 : f32
    %49 = vector.broadcast %cst_38 : f32 to vector<1x128xf32>
    %50 = arith.addf %49, %48 : vector<1x128xf32>
    %51 = arith.divf %49, %50 : vector<1x128xf32>
    %52 = vector.extract_strided_slice %41 {offsets = [0, 128], sizes = [1, 128], strides = [1, 1]} : vector<1x384xf32> to vector<1x128xf32>
    %53 = vector.extract_strided_slice %43 {offsets = [0, 128], sizes = [1, 128], strides = [1, 1]} : vector<1x384xf32> to vector<1x128xf32>
    %54 = arith.addf %52, %53 : vector<1x128xf32>
    %55 = arith.negf %54 : vector<1x128xf32>
    %56 = math.exp %55 : vector<1x128xf32>
    %cst_39 = arith.constant 1.000000e+00 : f32
    %57 = vector.broadcast %cst_39 : f32 to vector<1x128xf32>
    %58 = arith.addf %57, %56 : vector<1x128xf32>
    %59 = arith.divf %57, %58 : vector<1x128xf32>
    %60 = vector.extract_strided_slice %41 {offsets = [0, 256], sizes = [1, 128], strides = [1, 1]} : vector<1x384xf32> to vector<1x128xf32>
    %61 = vector.extract_strided_slice %43 {offsets = [0, 256], sizes = [1, 128], strides = [1, 1]} : vector<1x384xf32> to vector<1x128xf32>
    %c0_40 = arith.constant 0 : index
    %c0_41 = arith.constant 0 : index
    %62 = vector.load %arg5[%c0_40, %c0_41] : memref<1x128xf32, #tpu.memory_space<vmem>>, vector<1x128xf32>
    %63 = arith.addf %61, %62 : vector<1x128xf32>
    %64 = arith.mulf %51, %63 : vector<1x128xf32>
    %65 = arith.addf %60, %64 : vector<1x128xf32>
    %66 = math.tanh %65 : vector<1x128xf32>
    %67 = arith.subf %39, %66 : vector<1x128xf32>
    %68 = arith.mulf %59, %67 : vector<1x128xf32>
    %69 = arith.addf %66, %68 : vector<1x128xf32>
    %70 = arith.index_cast %c0_i32 : i32 to index
    %c0_42 = arith.constant 0 : index
    %71 = vector.load %arg13[%70, %c0_42] : memref<8x128xf32, #tpu.memory_space<vmem>>, vector<1x128xf32>
    tpu.vector_store %arg13[%70, %c0_42], %69 {strides = array<i32>} : memref<8x128xf32, #tpu.memory_space<vmem>>, vector<1x128xf32>,
    %c1_i32 = arith.constant 1 : i32
    %72 = arith.index_cast %c1_i32 : i32 to index
    %c0_43 = arith.constant 0 : index
    %73 = vector.load %arg12[%72, %c0_43] : memref<8x384xf32, #tpu.memory_space<vmem>>, vector<1x384xf32>
    %c0_44 = arith.constant 0 : index
    %c0_45 = arith.constant 0 : index
    %74 = vector.load %arg3[%c0_44, %c0_45] : memref<128x384xf32, #tpu.memory_space<vmem>>, vector<128x384xf32>
    %cst_46 = arith.constant dense<0.000000e+00> : vector<1x384xf32>
    %75 = tpu.matmul %69, %74, %cst_46 {dimension_numbers = #tpu.dot_dimension_numbers<[1], [0], [0], [1], [0, 0, 1, 1], [], []>} : vector<1x128xf32>, vector<128x384xf32>, vector<1x384xf32> -> vector<1x384xf32>
    %76 = vector.extract_strided_slice %73 {offsets = [0, 0], sizes = [1, 128], strides = [1, 1]} : vector<1x384xf32> to vector<1x128xf32>
    %77 = vector.extract_strided_slice %75 {offsets = [0, 0], sizes = [1, 128], strides = [1, 1]} : vector<1x384xf32> to vector<1x128xf32>
    %78 = arith.addf %76, %77 : vector<1x128xf32>
    %79 = arith.negf %78 : vector<1x128xf32>
    %80 = math.exp %79 : vector<1x128xf32>
    %cst_47 = arith.constant 1.000000e+00 : f32
    %81 = vector.broadcast %cst_47 : f32 to vector<1x128xf32>
    %82 = arith.addf %81, %80 : vector<1x128xf32>
    %83 = arith.divf %81, %82 : vector<1x128xf32>
    %84 = vector.extract_strided_slice %73 {offsets = [0, 128], sizes = [1, 128], strides = [1, 1]} : vector<1x384xf32> to vector<1x128xf32>
    %85 = vector.extract_strided_slice %75 {offsets = [0, 128], sizes = [1, 128], strides = [1, 1]} : vector<1x384xf32> to vector<1x128xf32>
    %86 = arith.addf %84, %85 : vector<1x128xf32>
    %87 = arith.negf %86 : vector<1x128xf32>
    %88 = math.exp %87 : vector<1x128xf32>
    %cst_48 = arith.constant 1.000000e+00 : f32
    %89 = vector.broadcast %cst_48 : f32 to vector<1x128xf32>
    %90 = arith.addf %89, %88 : vector<1x128xf32>
    %91 = arith.divf %89, %90 : vector<1x128xf32>
    %92 = vector.extract_strided_slice %73 {offsets = [0, 256], sizes = [1, 128], strides = [1, 1]} : vector<1x384xf32> to vector<1x128xf32>
    %93 = vector.extract_strided_slice %75 {offsets = [0, 256], sizes = [1, 128], strides = [1, 1]} : vector<1x384xf32> to vector<1x128xf32>
    %c0_49 = arith.constant 0 : index
    %c0_50 = arith.constant 0 : index
    %94 = vector.load %arg5[%c0_49, %c0_50] : memref<1x128xf32, #tpu.memory_space<vmem>>, vector<1x128xf32>
    %95 = arith.addf %93, %94 : vector<1x128xf32>
    %96 = arith.mulf %83, %95 : vector<1x128xf32>
    %97 = arith.addf %92, %96 : vector<1x128xf32>
    %98 = math.tanh %97 : vector<1x128xf32>
    %99 = arith.subf %69, %98 : vector<1x128xf32>
    %100 = arith.mulf %91, %99 : vector<1x128xf32>
    %101 = arith.addf %98, %100 : vector<1x128xf32>
    %102 = arith.index_cast %c1_i32 : i32 to index
    %c0_51 = arith.constant 0 : index
    %103 = vector.load %arg13[%102, %c0_51] : memref<8x128xf32, #tpu.memory_space<vmem>>, vector<1x128xf32>
    tpu.vector_store %arg13[%102, %c0_51], %101 {strides = array<i32>} : memref<8x128xf32, #tpu.memory_space<vmem>>, vector<1x128xf32>,
    %c2_i32 = arith.constant 2 : i32
    %104 = arith.index_cast %c2_i32 : i32 to index
    %c0_52 = arith.constant 0 : index
    %105 = vector.load %arg12[%104, %c0_52] : memref<8x384xf32, #tpu.memory_space<vmem>>, vector<1x384xf32>
    %c0_53 = arith.constant 0 : index
    %c0_54 = arith.constant 0 : index
    %106 = vector.load %arg3[%c0_53, %c0_54] : memref<128x384xf32, #tpu.memory_space<vmem>>, vector<128x384xf32>
    %cst_55 = arith.constant dense<0.000000e+00> : vector<1x384xf32>
    %107 = tpu.matmul %101, %106, %cst_55 {dimension_numbers = #tpu.dot_dimension_numbers<[1], [0], [0], [1], [0, 0, 1, 1], [], []>} : vector<1x128xf32>, vector<128x384xf32>, vector<1x384xf32> -> vector<1x384xf32>
    %108 = vector.extract_strided_slice %105 {offsets = [0, 0], sizes = [1, 128], strides = [1, 1]} : vector<1x384xf32> to vector<1x128xf32>
    %109 = vector.extract_strided_slice %107 {offsets = [0, 0], sizes = [1, 128], strides = [1, 1]} : vector<1x384xf32> to vector<1x128xf32>
    %110 = arith.addf %108, %109 : vector<1x128xf32>
    %111 = arith.negf %110 : vector<1x128xf32>
    %112 = math.exp %111 : vector<1x128xf32>
    %cst_56 = arith.constant 1.000000e+00 : f32
    %113 = vector.broadcast %cst_56 : f32 to vector<1x128xf32>
    %114 = arith.addf %113, %112 : vector<1x128xf32>
    %115 = arith.divf %113, %114 : vector<1x128xf32>
    %116 = vector.extract_strided_slice %105 {offsets = [0, 128], sizes = [1, 128], strides = [1, 1]} : vector<1x384xf32> to vector<1x128xf32>
    %117 = vector.extract_strided_slice %107 {offsets = [0, 128], sizes = [1, 128], strides = [1, 1]} : vector<1x384xf32> to vector<1x128xf32>
    %118 = arith.addf %116, %117 : vector<1x128xf32>
    %119 = arith.negf %118 : vector<1x128xf32>
    %120 = math.exp %119 : vector<1x128xf32>
    %cst_57 = arith.constant 1.000000e+00 : f32
    %121 = vector.broadcast %cst_57 : f32 to vector<1x128xf32>
    %122 = arith.addf %121, %120 : vector<1x128xf32>
    %123 = arith.divf %121, %122 : vector<1x128xf32>
    %124 = vector.extract_strided_slice %105 {offsets = [0, 256], sizes = [1, 128], strides = [1, 1]} : vector<1x384xf32> to vector<1x128xf32>
    %125 = vector.extract_strided_slice %107 {offsets = [0, 256], sizes = [1, 128], strides = [1, 1]} : vector<1x384xf32> to vector<1x128xf32>
    %c0_58 = arith.constant 0 : index
    %c0_59 = arith.constant 0 : index
    %126 = vector.load %arg5[%c0_58, %c0_59] : memref<1x128xf32, #tpu.memory_space<vmem>>, vector<1x128xf32>
    %127 = arith.addf %125, %126 : vector<1x128xf32>
    %128 = arith.mulf %115, %127 : vector<1x128xf32>
    %129 = arith.addf %124, %128 : vector<1x128xf32>
    %130 = math.tanh %129 : vector<1x128xf32>
    %131 = arith.subf %101, %130 : vector<1x128xf32>
    %132 = arith.mulf %123, %131 : vector<1x128xf32>
    %133 = arith.addf %130, %132 : vector<1x128xf32>
    %134 = arith.index_cast %c2_i32 : i32 to index
    %c0_60 = arith.constant 0 : index
    %135 = vector.load %arg13[%134, %c0_60] : memref<8x128xf32, #tpu.memory_space<vmem>>, vector<1x128xf32>
    tpu.vector_store %arg13[%134, %c0_60], %133 {strides = array<i32>} : memref<8x128xf32, #tpu.memory_space<vmem>>, vector<1x128xf32>,
    %c3_i32 = arith.constant 3 : i32
    %136 = arith.index_cast %c3_i32 : i32 to index
    %c0_61 = arith.constant 0 : index
    %137 = vector.load %arg12[%136, %c0_61] : memref<8x384xf32, #tpu.memory_space<vmem>>, vector<1x384xf32>
    %c0_62 = arith.constant 0 : index
    %c0_63 = arith.constant 0 : index
    %138 = vector.load %arg3[%c0_62, %c0_63] : memref<128x384xf32, #tpu.memory_space<vmem>>, vector<128x384xf32>
    %cst_64 = arith.constant dense<0.000000e+00> : vector<1x384xf32>
    %139 = tpu.matmul %133, %138, %cst_64 {dimension_numbers = #tpu.dot_dimension_numbers<[1], [0], [0], [1], [0, 0, 1, 1], [], []>} : vector<1x128xf32>, vector<128x384xf32>, vector<1x384xf32> -> vector<1x384xf32>
    %140 = vector.extract_strided_slice %137 {offsets = [0, 0], sizes = [1, 128], strides = [1, 1]} : vector<1x384xf32> to vector<1x128xf32>
    %141 = vector.extract_strided_slice %139 {offsets = [0, 0], sizes = [1, 128], strides = [1, 1]} : vector<1x384xf32> to vector<1x128xf32>
    %142 = arith.addf %140, %141 : vector<1x128xf32>
    %143 = arith.negf %142 : vector<1x128xf32>
    %144 = math.exp %143 : vector<1x128xf32>
    %cst_65 = arith.constant 1.000000e+00 : f32
    %145 = vector.broadcast %cst_65 : f32 to vector<1x128xf32>
    %146 = arith.addf %145, %144 : vector<1x128xf32>
    %147 = arith.divf %145, %146 : vector<1x128xf32>
    %148 = vector.extract_strided_slice %137 {offsets = [0, 128], sizes = [1, 128], strides = [1, 1]} : vector<1x384xf32> to vector<1x128xf32>
    %149 = vector.extract_strided_slice %139 {offsets = [0, 128], sizes = [1, 128], strides = [1, 1]} : vector<1x384xf32> to vector<1x128xf32>
    %150 = arith.addf %148, %149 : vector<1x128xf32>
    %151 = arith.negf %150 : vector<1x128xf32>
    %152 = math.exp %151 : vector<1x128xf32>
    %cst_66 = arith.constant 1.000000e+00 : f32
    %153 = vector.broadcast %cst_66 : f32 to vector<1x128xf32>
    %154 = arith.addf %153, %152 : vector<1x128xf32>
    %155 = arith.divf %153, %154 : vector<1x128xf32>
    %156 = vector.extract_strided_slice %137 {offsets = [0, 256], sizes = [1, 128], strides = [1, 1]} : vector<1x384xf32> to vector<1x128xf32>
    %157 = vector.extract_strided_slice %139 {offsets = [0, 256], sizes = [1, 128], strides = [1, 1]} : vector<1x384xf32> to vector<1x128xf32>
    %c0_67 = arith.constant 0 : index
    %c0_68 = arith.constant 0 : index
    %158 = vector.load %arg5[%c0_67, %c0_68] : memref<1x128xf32, #tpu.memory_space<vmem>>, vector<1x128xf32>
    %159 = arith.addf %157, %158 : vector<1x128xf32>
    %160 = arith.mulf %147, %159 : vector<1x128xf32>
    %161 = arith.addf %156, %160 : vector<1x128xf32>
    %162 = math.tanh %161 : vector<1x128xf32>
    %163 = arith.subf %133, %162 : vector<1x128xf32>
    %164 = arith.mulf %155, %163 : vector<1x128xf32>
    %165 = arith.addf %162, %164 : vector<1x128xf32>
    %166 = arith.index_cast %c3_i32 : i32 to index
    %c0_69 = arith.constant 0 : index
    %167 = vector.load %arg13[%166, %c0_69] : memref<8x128xf32, #tpu.memory_space<vmem>>, vector<1x128xf32>
    tpu.vector_store %arg13[%166, %c0_69], %165 {strides = array<i32>} : memref<8x128xf32, #tpu.memory_space<vmem>>, vector<1x128xf32>,
    %c4_i32 = arith.constant 4 : i32
    %168 = arith.index_cast %c4_i32 : i32 to index
    %c0_70 = arith.constant 0 : index
    %169 = vector.load %arg12[%168, %c0_70] : memref<8x384xf32, #tpu.memory_space<vmem>>, vector<1x384xf32>
    %c0_71 = arith.constant 0 : index
    %c0_72 = arith.constant 0 : index
    %170 = vector.load %arg3[%c0_71, %c0_72] : memref<128x384xf32, #tpu.memory_space<vmem>>, vector<128x384xf32>
    %cst_73 = arith.constant dense<0.000000e+00> : vector<1x384xf32>
    %171 = tpu.matmul %165, %170, %cst_73 {dimension_numbers = #tpu.dot_dimension_numbers<[1], [0], [0], [1], [0, 0, 1, 1], [], []>} : vector<1x128xf32>, vector<128x384xf32>, vector<1x384xf32> -> vector<1x384xf32>
    %172 = vector.extract_strided_slice %169 {offsets = [0, 0], sizes = [1, 128], strides = [1, 1]} : vector<1x384xf32> to vector<1x128xf32>
    %173 = vector.extract_strided_slice %171 {offsets = [0, 0], sizes = [1, 128], strides = [1, 1]} : vector<1x384xf32> to vector<1x128xf32>
    %174 = arith.addf %172, %173 : vector<1x128xf32>
    %175 = arith.negf %174 : vector<1x128xf32>
    %176 = math.exp %175 : vector<1x128xf32>
    %cst_74 = arith.constant 1.000000e+00 : f32
    %177 = vector.broadcast %cst_74 : f32 to vector<1x128xf32>
    %178 = arith.addf %177, %176 : vector<1x128xf32>
    %179 = arith.divf %177, %178 : vector<1x128xf32>
    %180 = vector.extract_strided_slice %169 {offsets = [0, 128], sizes = [1, 128], strides = [1, 1]} : vector<1x384xf32> to vector<1x128xf32>
    %181 = vector.extract_strided_slice %171 {offsets = [0, 128], sizes = [1, 128], strides = [1, 1]} : vector<1x384xf32> to vector<1x128xf32>
    %182 = arith.addf %180, %181 : vector<1x128xf32>
    %183 = arith.negf %182 : vector<1x128xf32>
    %184 = math.exp %183 : vector<1x128xf32>
    %cst_75 = arith.constant 1.000000e+00 : f32
    %185 = vector.broadcast %cst_75 : f32 to vector<1x128xf32>
    %186 = arith.addf %185, %184 : vector<1x128xf32>
    %187 = arith.divf %185, %186 : vector<1x128xf32>
    %188 = vector.extract_strided_slice %169 {offsets = [0, 256], sizes = [1, 128], strides = [1, 1]} : vector<1x384xf32> to vector<1x128xf32>
    %189 = vector.extract_strided_slice %171 {offsets = [0, 256], sizes = [1, 128], strides = [1, 1]} : vector<1x384xf32> to vector<1x128xf32>
    %c0_76 = arith.constant 0 : index
    %c0_77 = arith.constant 0 : index
    %190 = vector.load %arg5[%c0_76, %c0_77] : memref<1x128xf32, #tpu.memory_space<vmem>>, vector<1x128xf32>
    %191 = arith.addf %189, %190 : vector<1x128xf32>
    %192 = arith.mulf %179, %191 : vector<1x128xf32>
    %193 = arith.addf %188, %192 : vector<1x128xf32>
    %194 = math.tanh %193 : vector<1x128xf32>
    %195 = arith.subf %165, %194 : vector<1x128xf32>
    %196 = arith.mulf %187, %195 : vector<1x128xf32>
    %197 = arith.addf %194, %196 : vector<1x128xf32>
    %198 = arith.index_cast %c4_i32 : i32 to index
    %c0_78 = arith.constant 0 : index
    %199 = vector.load %arg13[%198, %c0_78] : memref<8x128xf32, #tpu.memory_space<vmem>>, vector<1x128xf32>
    tpu.vector_store %arg13[%198, %c0_78], %197 {strides = array<i32>} : memref<8x128xf32, #tpu.memory_space<vmem>>, vector<1x128xf32>,
    %c5_i32 = arith.constant 5 : i32
    %200 = arith.index_cast %c5_i32 : i32 to index
    %c0_79 = arith.constant 0 : index
    %201 = vector.load %arg12[%200, %c0_79] : memref<8x384xf32, #tpu.memory_space<vmem>>, vector<1x384xf32>
    %c0_80 = arith.constant 0 : index
    %c0_81 = arith.constant 0 : index
    %202 = vector.load %arg3[%c0_80, %c0_81] : memref<128x384xf32, #tpu.memory_space<vmem>>, vector<128x384xf32>
    %cst_82 = arith.constant dense<0.000000e+00> : vector<1x384xf32>
    %203 = tpu.matmul %197, %202, %cst_82 {dimension_numbers = #tpu.dot_dimension_numbers<[1], [0], [0], [1], [0, 0, 1, 1], [], []>} : vector<1x128xf32>, vector<128x384xf32>, vector<1x384xf32> -> vector<1x384xf32>
    %204 = vector.extract_strided_slice %201 {offsets = [0, 0], sizes = [1, 128], strides = [1, 1]} : vector<1x384xf32> to vector<1x128xf32>
    %205 = vector.extract_strided_slice %203 {offsets = [0, 0], sizes = [1, 128], strides = [1, 1]} : vector<1x384xf32> to vector<1x128xf32>
    %206 = arith.addf %204, %205 : vector<1x128xf32>
    %207 = arith.negf %206 : vector<1x128xf32>
    %208 = math.exp %207 : vector<1x128xf32>
    %cst_83 = arith.constant 1.000000e+00 : f32
    %209 = vector.broadcast %cst_83 : f32 to vector<1x128xf32>
    %210 = arith.addf %209, %208 : vector<1x128xf32>
    %211 = arith.divf %209, %210 : vector<1x128xf32>
    %212 = vector.extract_strided_slice %201 {offsets = [0, 128], sizes = [1, 128], strides = [1, 1]} : vector<1x384xf32> to vector<1x128xf32>
    %213 = vector.extract_strided_slice %203 {offsets = [0, 128], sizes = [1, 128], strides = [1, 1]} : vector<1x384xf32> to vector<1x128xf32>
    %214 = arith.addf %212, %213 : vector<1x128xf32>
    %215 = arith.negf %214 : vector<1x128xf32>
    %216 = math.exp %215 : vector<1x128xf32>
    %cst_84 = arith.constant 1.000000e+00 : f32
    %217 = vector.broadcast %cst_84 : f32 to vector<1x128xf32>
    %218 = arith.addf %217, %216 : vector<1x128xf32>
    %219 = arith.divf %217, %218 : vector<1x128xf32>
    %220 = vector.extract_strided_slice %201 {offsets = [0, 256], sizes = [1, 128], strides = [1, 1]} : vector<1x384xf32> to vector<1x128xf32>
    %221 = vector.extract_strided_slice %203 {offsets = [0, 256], sizes = [1, 128], strides = [1, 1]} : vector<1x384xf32> to vector<1x128xf32>
    %c0_85 = arith.constant 0 : index
    %c0_86 = arith.constant 0 : index
    %222 = vector.load %arg5[%c0_85, %c0_86] : memref<1x128xf32, #tpu.memory_space<vmem>>, vector<1x128xf32>
    %223 = arith.addf %221, %222 : vector<1x128xf32>
    %224 = arith.mulf %211, %223 : vector<1x128xf32>
    %225 = arith.addf %220, %224 : vector<1x128xf32>
    %226 = math.tanh %225 : vector<1x128xf32>
    %227 = arith.subf %197, %226 : vector<1x128xf32>
    %228 = arith.mulf %219, %227 : vector<1x128xf32>
    %229 = arith.addf %226, %228 : vector<1x128xf32>
    %230 = arith.index_cast %c5_i32 : i32 to index
    %c0_87 = arith.constant 0 : index
    %231 = vector.load %arg13[%230, %c0_87] : memref<8x128xf32, #tpu.memory_space<vmem>>, vector<1x128xf32>
    tpu.vector_store %arg13[%230, %c0_87], %229 {strides = array<i32>} : memref<8x128xf32, #tpu.memory_space<vmem>>, vector<1x128xf32>,
    %c6_i32 = arith.constant 6 : i32
    %232 = arith.index_cast %c6_i32 : i32 to index
    %c0_88 = arith.constant 0 : index
    %233 = vector.load %arg12[%232, %c0_88] : memref<8x384xf32, #tpu.memory_space<vmem>>, vector<1x384xf32>
    %c0_89 = arith.constant 0 : index
    %c0_90 = arith.constant 0 : index
    %234 = vector.load %arg3[%c0_89, %c0_90] : memref<128x384xf32, #tpu.memory_space<vmem>>, vector<128x384xf32>
    %cst_91 = arith.constant dense<0.000000e+00> : vector<1x384xf32>
    %235 = tpu.matmul %229, %234, %cst_91 {dimension_numbers = #tpu.dot_dimension_numbers<[1], [0], [0], [1], [0, 0, 1, 1], [], []>} : vector<1x128xf32>, vector<128x384xf32>, vector<1x384xf32> -> vector<1x384xf32>
    %236 = vector.extract_strided_slice %233 {offsets = [0, 0], sizes = [1, 128], strides = [1, 1]} : vector<1x384xf32> to vector<1x128xf32>
    %237 = vector.extract_strided_slice %235 {offsets = [0, 0], sizes = [1, 128], strides = [1, 1]} : vector<1x384xf32> to vector<1x128xf32>
    %238 = arith.addf %236, %237 : vector<1x128xf32>
    %239 = arith.negf %238 : vector<1x128xf32>
    %240 = math.exp %239 : vector<1x128xf32>
    %cst_92 = arith.constant 1.000000e+00 : f32
    %241 = vector.broadcast %cst_92 : f32 to vector<1x128xf32>
    %242 = arith.addf %241, %240 : vector<1x128xf32>
    %243 = arith.divf %241, %242 : vector<1x128xf32>
    %244 = vector.extract_strided_slice %233 {offsets = [0, 128], sizes = [1, 128], strides = [1, 1]} : vector<1x384xf32> to vector<1x128xf32>
    %245 = vector.extract_strided_slice %235 {offsets = [0, 128], sizes = [1, 128], strides = [1, 1]} : vector<1x384xf32> to vector<1x128xf32>
    %246 = arith.addf %244, %245 : vector<1x128xf32>
    %247 = arith.negf %246 : vector<1x128xf32>
    %248 = math.exp %247 : vector<1x128xf32>
    %cst_93 = arith.constant 1.000000e+00 : f32
    %249 = vector.broadcast %cst_93 : f32 to vector<1x128xf32>
    %250 = arith.addf %249, %248 : vector<1x128xf32>
    %251 = arith.divf %249, %250 : vector<1x128xf32>
    %252 = vector.extract_strided_slice %233 {offsets = [0, 256], sizes = [1, 128], strides = [1, 1]} : vector<1x384xf32> to vector<1x128xf32>
    %253 = vector.extract_strided_slice %235 {offsets = [0, 256], sizes = [1, 128], strides = [1, 1]} : vector<1x384xf32> to vector<1x128xf32>
    %c0_94 = arith.constant 0 : index
    %c0_95 = arith.constant 0 : index
    %254 = vector.load %arg5[%c0_94, %c0_95] : memref<1x128xf32, #tpu.memory_space<vmem>>, vector<1x128xf32>
    %255 = arith.addf %253, %254 : vector<1x128xf32>
    %256 = arith.mulf %243, %255 : vector<1x128xf32>
    %257 = arith.addf %252, %256 : vector<1x128xf32>
    %258 = math.tanh %257 : vector<1x128xf32>
    %259 = arith.subf %229, %258 : vector<1x128xf32>
    %260 = arith.mulf %251, %259 : vector<1x128xf32>
    %261 = arith.addf %258, %260 : vector<1x128xf32>
    %262 = arith.index_cast %c6_i32 : i32 to index
    %c0_96 = arith.constant 0 : index
    %263 = vector.load %arg13[%262, %c0_96] : memref<8x128xf32, #tpu.memory_space<vmem>>, vector<1x128xf32>
    tpu.vector_store %arg13[%262, %c0_96], %261 {strides = array<i32>} : memref<8x128xf32, #tpu.memory_space<vmem>>, vector<1x128xf32>,
    %c7_i32 = arith.constant 7 : i32
    %264 = arith.index_cast %c7_i32 : i32 to index
    %c0_97 = arith.constant 0 : index
    %265 = vector.load %arg12[%264, %c0_97] : memref<8x384xf32, #tpu.memory_space<vmem>>, vector<1x384xf32>
    %c0_98 = arith.constant 0 : index
    %c0_99 = arith.constant 0 : index
    %266 = vector.load %arg3[%c0_98, %c0_99] : memref<128x384xf32, #tpu.memory_space<vmem>>, vector<128x384xf32>
    %cst_100 = arith.constant dense<0.000000e+00> : vector<1x384xf32>
    %267 = tpu.matmul %261, %266, %cst_100 {dimension_numbers = #tpu.dot_dimension_numbers<[1], [0], [0], [1], [0, 0, 1, 1], [], []>} : vector<1x128xf32>, vector<128x384xf32>, vector<1x384xf32> -> vector<1x384xf32>
    %268 = vector.extract_strided_slice %265 {offsets = [0, 0], sizes = [1, 128], strides = [1, 1]} : vector<1x384xf32> to vector<1x128xf32>
    %269 = vector.extract_strided_slice %267 {offsets = [0, 0], sizes = [1, 128], strides = [1, 1]} : vector<1x384xf32> to vector<1x128xf32>
    %270 = arith.addf %268, %269 : vector<1x128xf32>
    %271 = arith.negf %270 : vector<1x128xf32>
    %272 = math.exp %271 : vector<1x128xf32>
    %cst_101 = arith.constant 1.000000e+00 : f32
    %273 = vector.broadcast %cst_101 : f32 to vector<1x128xf32>
    %274 = arith.addf %273, %272 : vector<1x128xf32>
    %275 = arith.divf %273, %274 : vector<1x128xf32>
    %276 = vector.extract_strided_slice %265 {offsets = [0, 128], sizes = [1, 128], strides = [1, 1]} : vector<1x384xf32> to vector<1x128xf32>
    %277 = vector.extract_strided_slice %267 {offsets = [0, 128], sizes = [1, 128], strides = [1, 1]} : vector<1x384xf32> to vector<1x128xf32>
    %278 = arith.addf %276, %277 : vector<1x128xf32>
    %279 = arith.negf %278 : vector<1x128xf32>
    %280 = math.exp %279 : vector<1x128xf32>
    %cst_102 = arith.constant 1.000000e+00 : f32
    %281 = vector.broadcast %cst_102 : f32 to vector<1x128xf32>
    %282 = arith.addf %281, %280 : vector<1x128xf32>
    %283 = arith.divf %281, %282 : vector<1x128xf32>
    %284 = vector.extract_strided_slice %265 {offsets = [0, 256], sizes = [1, 128], strides = [1, 1]} : vector<1x384xf32> to vector<1x128xf32>
    %285 = vector.extract_strided_slice %267 {offsets = [0, 256], sizes = [1, 128], strides = [1, 1]} : vector<1x384xf32> to vector<1x128xf32>
    %c0_103 = arith.constant 0 : index
    %c0_104 = arith.constant 0 : index
    %286 = vector.load %arg5[%c0_103, %c0_104] : memref<1x128xf32, #tpu.memory_space<vmem>>, vector<1x128xf32>
    %287 = arith.addf %285, %286 : vector<1x128xf32>
    %288 = arith.mulf %275, %287 : vector<1x128xf32>
    %289 = arith.addf %284, %288 : vector<1x128xf32>
    %290 = math.tanh %289 : vector<1x128xf32>
    %291 = arith.subf %261, %290 : vector<1x128xf32>
    %292 = arith.mulf %283, %291 : vector<1x128xf32>
    %293 = arith.addf %290, %292 : vector<1x128xf32>
    %294 = arith.index_cast %c7_i32 : i32 to index
    %c0_105 = arith.constant 0 : index
    %295 = vector.load %arg13[%294, %c0_105] : memref<8x128xf32, #tpu.memory_space<vmem>>, vector<1x128xf32>
    tpu.vector_store %arg13[%294, %c0_105], %293 {strides = array<i32>} : memref<8x128xf32, #tpu.memory_space<vmem>>, vector<1x128xf32>,
    %c8_i32 = arith.constant 8 : i32
    %c0_106 = arith.constant 0 : index
    %c0_107 = arith.constant 0 : index
    %296 = vector.load %arg10[%c0_106, %c0_107] : memref<1x128xf32, #tpu.memory_space<vmem>>, vector<1x128xf32>
    tpu.vector_store %arg10[%c0_106, %c0_107], %293 {strides = array<i32>} : memref<1x128xf32, #tpu.memory_space<vmem>>, vector<1x128xf32>,
    %c0_108 = arith.constant 0 : index
    %c0_109 = arith.constant 0 : index
    %297 = vector.load %arg13[%c0_108, %c0_109] : memref<8x128xf32, #tpu.memory_space<vmem>>, vector<8x128xf32>
    %c0_110 = arith.constant 0 : index
    %c0_111 = arith.constant 0 : index
    %298 = vector.load %arg6[%c0_110, %c0_111] : memref<128x128xf32, #tpu.memory_space<vmem>>, vector<128x128xf32>
    %cst_112 = arith.constant dense<0.000000e+00> : vector<8x128xf32>
    %299 = tpu.matmul %297, %298, %cst_112 {dimension_numbers = #tpu.dot_dimension_numbers<[1], [0], [0], [1], [0, 0, 1, 1], [], []>} : vector<8x128xf32>, vector<128x128xf32>, vector<8x128xf32> -> vector<8x128xf32>
    %c0_113 = arith.constant 0 : index
    %c0_114 = arith.constant 0 : index
    %300 = vector.load %arg7[%c0_113, %c0_114] : memref<1x128xf32, #tpu.memory_space<vmem>>, vector<1x128xf32>
    %301 = vector.broadcast %300 : vector<1x128xf32> to vector<8x128xf32>
    %302 = arith.addf %299, %301 : vector<8x128xf32>
    %cst_115 = arith.constant dense<0xFF800000> : vector<8xf32>
    %303 = vector.multi_reduction <maximumf>, %302, %cst_115 [1] : vector<8x128xf32> to vector<8xf32>
    %304 = vector.shape_cast %303 : vector<8xf32> to vector<8x1xf32>
    %305 = vector.broadcast %304 : vector<8x1xf32> to vector<8x128xf32>
    %306 = arith.subf %302, %305 : vector<8x128xf32>
    %307 = math.exp %306 : vector<8x128xf32>
    %cst_116 = arith.constant dense<0.000000e+00> : vector<8xf32>
    %308 = vector.multi_reduction <add>, %307, %cst_116 [1] : vector<8x128xf32> to vector<8xf32>
    %309 = vector.shape_cast %308 : vector<8xf32> to vector<8x1xf32>
    %310 = tpu.reciprocal %309 {approx = true} : vector<8x1xf32> -> vector<8x1xf32>
    %311 = arith.mulf %309, %310 : vector<8x1xf32>
    %cst_117 = arith.constant 2.000000e+00 : f32
    %312 = vector.broadcast %cst_117 : f32 to vector<8x1xf32>
    %313 = arith.subf %312, %311 : vector<8x1xf32>
    %314 = arith.mulf %310, %313 : vector<8x1xf32>
    %315 = vector.broadcast %314 : vector<8x1xf32> to vector<8x128xf32>
    %316 = arith.mulf %307, %315 : vector<8x128xf32>
    %c0_118 = arith.constant 0 : index
    %c0_119 = arith.constant 0 : index
    %317 = vector.load %arg9[%c0_118, %c0_119] : memref<8x128xf32, #tpu.memory_space<vmem>>, vector<8x128xf32>
    tpu.vector_store %arg9[%c0_118, %c0_119], %316 {strides = array<i32>} : memref<8x128xf32, #tpu.memory_space<vmem>>, vector<8x128xf32>,
    return
  }
}

</mosaic_0001>

<bundles_post_ra>
// kernel: gru_pos_tagger_forward.1
= control target key start
LH: loop header
LB: loop body
LE: loop exit
PB: predicated region body
PF: predicated region fallthrough
CT: control target
= control target key end

     0   :  { %16 = vsyncpa [#allocation7], 0  ;;  %s4109_s0 = inlined_call_operand.vmem [shape: s32[8], index: 0, kind: input, shape index: {}]   ;;  %s4110_s1 = inlined_call_operand.vmem [shape: f32[16,128], index: 1, kind: input, shape index: {}]   ;;  %s4111_s2 = inlined_call_operand.hbm [shape: f32[128,384], index: 2, kind: input, shape index: {}]   ;;  %s4112_s3 = inlined_call_operand.hbm [shape: f32[128,384], index: 3, kind: input, shape index: {}]   ;;  %s4113_s4 = inlined_call_operand.vmem [shape: f32[1,384], index: 4, kind: input, shape index: {}]   ;;  %s4114_s5 = inlined_call_operand.vmem [shape: f32[1,128], index: 5, kind: input, shape index: {}]   ;;  %s4115_s6 = inlined_call_operand.hbm [shape: f32[128,128], index: 6, kind: input, shape index: {}]   ;;  %s4116_s7 = inlined_call_operand.vmem [shape: f32[1,128], index: 7, kind: input, shape index: {}]   ;;  %s4117_s8 = inlined_call_operand.vmem [shape: f32[1,128], index: 8, kind: input, shape index: {}]   ;;  %s4118_s9 = inlined_call_operand.vmem [shape: f32[8,128], index: 9, kind: output, shape index: {0}]   ;;  %s4119_s10 = inlined_call_operand.vmem [shape: f32[1,128], index: 10, kind: output, shape index: {1}]  }
   0x1   :  { %17 = vsyncpa [#allocation6], 0 }
   0x2   :  { %18 = vsyncpa [#allocation10], 0  ;;  %s25_s15 = sshll.u32 %s4109_s0, 4  ;;  %s3460_s16 = smov [#allocation9]   ;;  %s26_s15 = int_to_ptr.vmem [resolvable:$true] %s25_s15 }
   0x3   :  { %s48_s17 = sshll.u32 %s3460_s16, 4  ;;  %s3376_s20 = scalar_lea.hbm %s4112_s3, 6144  ;;  %s49_s17 = int_to_ptr.vmem [resolvable:$true] %s48_s17 }
   0x4   :  { %p3377_p0 = scmp.ne.s32.totalorder %s4112_s3, %s3376_s20  ;;  %p3380_p1 = scmp.lt.u32.totalorder %s3376_s20, %s4112_s3 }
   0x6   :  { %p3382_p2 = pnand %p3380_p1, %p3377_p0 }
   0x8   :  { %3385 = shalt.err (!%p3382_p2)
}
   0x9   :  { %s3386_s25 = scalar_lea.vmem %s49_s17, 6144  ;;  %p3391_p4 = scmp.lt.s32.totalorder %s49_s17, %s49_s17 }
   0xa   :  { %p3387_p3 = scmp.ne.s32.totalorder %s49_s17, %s3386_s25  ;;  %p3392_p5 = scmp.lt.s32.totalorder %s3386_s25, %s3386_s25 }
   0xc   :  { %p3393_p6 = por %p3392_p5, %p3391_p4 }
   0xe   :  { %p3394_p7 = pnand %p3393_p6, %p3387_p3 }
  0x10   :  { %3397 = shalt.err (!%p3394_p7)
}
  0x11   :  { %s3461_s0 = smov 384   ;;  %s3462_s26 = smov 24  }
  0x12   :  { %54 = dma.hbm_to_vmem [thread:$0]  %s4112_s3, 6144, %s49_s17, [#allocation10], %s3461_s0, %s3461_s0, %s3462_s26  }
  0x13   :  { %s3398_s29 = scalar_lea.vmem %s26_s15, 16  ;;  %p3403_p9 = scmp.lt.s32.totalorder %s26_s15, %s26_s15 }
  0x14   :  { %p3399_p8 = scmp.ne.s32.totalorder %s26_s15, %s3398_s29  ;;  %p3404_p10 = scmp.lt.s32.totalorder %s3398_s29, %s3398_s29 }
  0x16   :  { %p3405_p11 = por %p3404_p10, %p3403_p9 }
  0x18   :  { %p3406_p12 = pnand %p3405_p11, %p3399_p8 }
  0x1a   :  { %3409 = shalt.err (!%p3406_p12)
}
  0x1b   :  { %s3463_s30 = smov [#allocation5]   ;;  %s3464_s11 = smov [#allocation8]  }
  0x1c   :  { %28 = dma.vmem_to_smem %s26_s15, 16, %s3463_s30, [#allocation7]  }
  0x1d   :  { %s36_s12 = sshll.u32 %s3464_s11, 4  ;;  %s3465_s13 = smov [#allocation11]   ;;  %s37_s12 = int_to_ptr.vmem [resolvable:$true] %s36_s12 }
  0x1e   :  { %s64_s14 = sshll.u32 %s3465_s13, 4  ;;  %s3410_s3 = scalar_lea.hbm %s4111_s2, 6144  ;;  %s3544_s14 = int_to_ptr.vmem [resolvable:$true] %s64_s14 }
  0x1f   :  { %p3411_p13 = scmp.ne.s32.totalorder %s4111_s2, %s3410_s3  ;;  %p3414_p0 = scmp.lt.u32.totalorder %s3410_s3, %s4111_s2 }
  0x21   :  { %p3416_p1 = pnand %p3414_p0, %p3411_p13 }
  0x23   :  { %3419 = shalt.err (!%p3416_p1)
}
  0x24   :  { %s3420_s15 = scalar_lea.vmem %s37_s12, 6144  ;;  %p3425_p3 = scmp.lt.s32.totalorder %s37_s12, %s37_s12 }
  0x25   :  { %p3421_p2 = scmp.ne.s32.totalorder %s37_s12, %s3420_s15  ;;  %p3426_p4 = scmp.lt.s32.totalorder %s3420_s15, %s3420_s15 }
  0x27   :  { %p3427_p5 = por %p3426_p4, %p3425_p3 }
  0x29   :  { %p3428_p6 = pnand %p3427_p5, %p3421_p2 }
  0x2b   :  { %3431 = shalt.err (!%p3428_p6)
}
  0x2c   :  { %42 = dma.hbm_to_vmem [thread:$0]  %s4111_s2, 6144, %s37_s12, [#allocation6], %s3461_s0, %s3461_s0, %s3462_s26  }
  0x2d   :  { %s3432_s27 = scalar_lea.hbm %s4115_s6, 2048 }
  0x2e   :  { %p3433_p7 = scmp.ne.s32.totalorder %s4115_s6, %s3432_s27  ;;  %p3436_p8 = scmp.lt.u32.totalorder %s3432_s27, %s4115_s6 }
  0x30   :  { %p3438_p9 = pnand %p3436_p8, %p3433_p7 }
  0x32   :  { %3441 = shalt.err (!%p3438_p9)
}
  0x33   :  { %s3442_s13 = scalar_lea.vmem %s3544_s14, 2048  ;;  %p3447_p11 = scmp.lt.s32.totalorder %s3544_s14, %s3544_s14 }
  0x34   :  { %p3443_p10 = scmp.ne.s32.totalorder %s3544_s14, %s3442_s13  ;;  %p3448_p12 = scmp.lt.s32.totalorder %s3442_s13, %s3442_s13 }
  0x36   :  { %p3449_p13 = por %p3448_p12, %p3447_p11 }
  0x38   :  { %p3450_p0 = pnand %p3449_p13, %p3443_p10 }
  0x3a   :  { %3453 = shalt.err (!%p3450_p0)
}
  0x3b   :  { %s3466_s2 = smov 128   ;;  %s3467_s0 = smov 8  }
  0x3c   :  { %70 = dma.hbm_to_vmem [thread:$0]  %s4115_s6, 2048, %s3544_s14, [#allocation10], %s3466_s2, %s3466_s2, %s3467_s0  }
  0x3d   :  { %3454 = dma.done.wait [#allocation7], 16  }
  0x3e   :  { %3455 = vsyncadd [#allocation7], 4294967280 }
  0x3f   :  { %3456 = dma.done.wait [#allocation6], 6144  }
  0x40   :  { %3457 = vsyncadd [#allocation6], 4294961152 }
  0x41   :  { %3458 = dma.done.wait [#allocation10], 8192  }
  0x42   :  { %3459 = vsyncadd [#allocation10], 4294959104 }
  0x43   :  { %87 = sfence }
  0x44   :  { %v122_v0 = vld [vmem:[#allocation8 + $0x8] sm:$0xff]  ;;  %v125_v1 = vld [vmem:[#allocation8 + $0x20] sm:$0xff]  ;;  %v124_v4 = vld [vmem:[#allocation8 + $0x18] sm:$0xff]  ;;  %v3468_v5 = vmov 0.0|0.0   ;;  %v3469_v8 = vmov 0.0   ;;  %s3580_s6 = sld [smem:[#allocation5]] }
  0x45   :  { %v121_v2 = vld [vmem:[#allocation8] sm:$0xff]  ;;  %v2753_v3 = vpack.c.bf16 %v125_v1, %v122_v0  ;;  %2785 = vmatprep.subr.bf16.mxu1 %v3468_v5  ;;  %v123_v6 = vld [vmem:[#allocation8 + $0x10] sm:$0xff]  ;;  %v126_v7 = vld [vmem:[#allocation8 + $0x28] sm:$0xff]  ;;  %250 = vmatprep.mubr.f32.mxu0 %v3469_v8  ;;  %vm3470_vm0 = vmmov 0   ;;  %s3584_s14 = sld [smem:[#allocation5 + $0x1]]  ;;  %s3586_s16 = sld [smem:[#allocation5 + $0x2]] }
  0x46   :  { %v2755_v9 = vpack.c.bf16 %v124_v4, %v121_v2  ;;  %v2786_v10 = vpack.c.bf16 %v126_v7, %v123_v6  ;;  %v128_v11 = vld [vmem:[#allocation8 + $0x38] sm:$0xff]  ;;  %v131_v12 = vld [vmem:[#allocation8 + $0x50] sm:$0xff]  ;;  %2435 = vmatprep.mubr.msk.f32.mxu1 %vm3470_vm0, %v3469_v8  ;;  %v130_v15 = vld [vmem:[#allocation8 + $0x48] sm:$0xff]  ;;  %s3589_s18 = sld [smem:[#allocation5 + $0x3]]  ;;  %s3591_s3 = sld [smem:[#allocation5 + $0x4]] }
  0x47   :  { %v127_v13 = vld [vmem:[#allocation8 + $0x30] sm:$0xff]  ;;  %2754 = vmatprep.subr.bf16.mxu0 %v2753_v3  ;;  %v2757_v14 = vpack.c.bf16 %v131_v12, %v128_v11  ;;  %v129_v16 = vld [vmem:[#allocation8 + $0x40] sm:$0xff]  ;;  %v132_v17 = vld [vmem:[#allocation8 + $0x58] sm:$0xff]  ;;  %s3593_s17 = sld [smem:[#allocation5 + $0x5]]  ;;  %s3595_s19 = sld [smem:[#allocation5 + $0x6]] }
  0x48   :  { %2756 = vmatpush1.bf16.msra.mxu0 %v2755_v9  ;;  %2787 = vmatpush3.bf16.msra.mxu1 %v2786_v10  ;;  %v2759_v18 = vpack.c.bf16 %v130_v15, %v127_v13  ;;  %v2789_v19 = vpack.c.bf16 %v132_v17, %v129_v16  ;;  %v134_v20 = vld [vmem:[#allocation8 + $0x68] sm:$0xff]  ;;  %v137_v21 = vld [vmem:[#allocation8 + $0x80] sm:$0xff]  ;;  %v136_v24 = vld [vmem:[#allocation8 + $0x78] sm:$0xff]  ;;  %s3597_s20 = sld [smem:[#allocation5 + $0x7]] }
  0x49   :  { %v133_v22 = vld [vmem:[#allocation8 + $0x60] sm:$0xff]  ;;  %2758 = vmatprep.subr.bf16.mxu0 %v2757_v14  ;;  %2788 = vmatprep.subr.bf16.mxu1 %v3468_v5  ;;  %v2761_v23 = vpack.c.bf16 %v137_v21, %v134_v20  ;;  %v135_v25 = vld [vmem:[#allocation8 + $0x70] sm:$0xff]  ;;  %v138_v26 = vld [vmem:[#allocation8 + $0x88] sm:$0xff] }
  0x4a   :  { %v140_v27 = vld [vmem:[#allocation8 + $0x98] sm:$0xff]  ;;  %v143_v28 = vld [vmem:[#allocation8 + $0xb0] sm:$0xff]  ;;  %v2763_v29 = vpack.c.bf16 %v136_v24, %v133_v22  ;;  %v2792_v30 = vpack.c.bf16 %v138_v26, %v135_v25  ;;  %v142_v33 = vld [vmem:[#allocation8 + $0xa8] sm:$0xff]  ;;  %s89_s22 = scalar_lea.vmem %s4110_s1, %s3580_s6 }
  0x4b   :  { %v139_v31 = vld [vmem:[#allocation8 + $0x90] sm:$0xff]  ;;  %v2765_v32 = vpack.c.bf16 %v143_v28, %v140_v27  ;;  %v141_v34 = vld [vmem:[#allocation8 + $0xa0] sm:$0xff]  ;;  %v144_v35 = vld [vmem:[#allocation8 + $0xb8] sm:$0xff]  ;;  %s93_s25 = scalar_lea.vmem %s4110_s1, %s3584_s14  ;;  %s97_s29 = scalar_lea.vmem %s4110_s1, %s3586_s16 }
  0x4c   :  { %2760 = vmatpush1.bf16.msra.mxu0 %v2759_v18  ;;  %2790 = vmatpush3.bf16.msra.mxu1 %v2789_v19  ;;  %v146_v36 = vld [vmem:[#allocation8 + $0xc8] sm:$0xff]  ;;  %v149_v37 = vld [vmem:[#allocation8 + $0xe0] sm:$0xff]  ;;  %v2767_v38 = vpack.c.bf16 %v142_v33, %v139_v31  ;;  %v2795_v39 = vpack.c.bf16 %v144_v35, %v141_v34  ;;  %v148_v42 = vld [vmem:[#allocation8 + $0xd8] sm:$0xff]  ;;  %s101_s13 = scalar_lea.vmem %s4110_s1, %s3589_s18  ;;  %s105_s26 = scalar_lea.vmem %s4110_s1, %s3591_s3 }
  0x4d   :  { %2762 = vmatprep.subr.bf16.mxu0 %v2761_v23  ;;  %2791 = vmatprep.subr.bf16.mxu1 %v3468_v5  ;;  %v145_v40 = vld [vmem:[#allocation8 + $0xc0] sm:$0xff]  ;;  %v2769_v41 = vpack.c.bf16 %v149_v37, %v146_v36  ;;  %v147_v43 = vld [vmem:[#allocation8 + $0xd0] sm:$0xff]  ;;  %v150_v44 = vld [vmem:[#allocation8 + $0xe8] sm:$0xff]  ;;  %s109_s14 = scalar_lea.vmem %s4110_s1, %s3593_s17  ;;  %s113_s15 = scalar_lea.vmem %s4110_s1, %s3595_s19 }
  0x4e   :  { %v152_v45 = vld [vmem:[#allocation8 + $0xf8] sm:$0xff]  ;;  %v155_v46 = vld [vmem:[#allocation8 + $0x110] sm:$0xff]  ;;  %v154_v48 = vld [vmem:[#allocation8 + $0x108] sm:$0xff]  ;;  %s117_s24 = scalar_lea.vmem %s4110_s1, %s3597_s20  ;;  %v2771_v51 = vpack.c.bf16 %v148_v42, %v145_v40  ;;  %v2798_v52 = vpack.c.bf16 %v150_v44, %v147_v43 }
  0x4f   :  { %v151_v47 = vld [vmem:[#allocation8 + $0xf0] sm:$0xff]  ;;  %v153_v49 = vld [vmem:[#allocation8 + $0x100] sm:$0xff]  ;;  %v156_v50 = vld [vmem:[#allocation8 + $0x118] sm:$0xff]  ;;  %v2773_v57 = vpack.c.bf16 %v155_v46, %v152_v45 }
  0x50   :  { %2764 = vmatpush1.bf16.msra.mxu0 %v2763_v29  ;;  %2793 = vmatpush3.bf16.msra.mxu1 %v2792_v30  ;;  %v158_v53 = vld [vmem:[#allocation8 + $0x128] sm:$0xff]  ;;  %v90_v54 = vld [vmem:[%s89_s22] sm:$0x1]  ;;  %v161_v61 = vld [vmem:[#allocation8 + $0x140] sm:$0xff]  ;;  %v2775_v0 = vpack.c.bf16 %v154_v48, %v151_v47  ;;  %v2801_v1 = vpack.c.bf16 %v156_v50, %v153_v49 }
  0x51   :  { %2766 = vmatprep.subr.bf16.mxu0 %v2765_v32  ;;  %2794 = vmatprep.subr.bf16.mxu1 %v3468_v5  ;;  %v94_v55 = vld [vmem:[%s93_s25] sm:$0x1]  ;;  %91 = vst [vmem:[#allocation2] sm:$0x1] %v90_v54  ;;  %v157_v2 = vld [vmem:[#allocation8 + $0x120] sm:$0xff]  ;;  %v2777_v3 = vpack.c.bf16 %v161_v61, %v158_v53  ;;  %v159_v6 = vld [vmem:[#allocation8 + $0x130] sm:$0xff] }
  0x52   :  { %v98_v56 = vld [vmem:[%s97_s29] sm:$0x1]  ;;  %95 = vst [vmem:[#allocation2 + $0x1] sm:$0x1] %v94_v55  ;;  %v162_v7 = vld [vmem:[#allocation8 + $0x148] sm:$0xff]  ;;  %v167_v10 = vld [vmem:[#allocation8 + $0x170] sm:$0xff] }
  0x53   :  { %99 = vst [vmem:[#allocation2 + $0x2] sm:$0x1] %v98_v56  ;;  %v102_v58 = vld [vmem:[%s101_s13] sm:$0x1]  ;;  %v2804_v12 = vpack.c.bf16 %v162_v7, %v159_v6  ;;  %v163_v13 = vld [vmem:[#allocation8 + $0x150] sm:$0xff]  ;;  %v166_v15 = vld [vmem:[#allocation8 + $0x168] sm:$0xff] }
  0x54   :  { %2768 = vmatpush1.bf16.msra.mxu0 %v2767_v38  ;;  %2796 = vmatpush3.bf16.msra.mxu1 %v2795_v39  ;;  %v106_v59 = vld [vmem:[%s105_s26] sm:$0x1]  ;;  %103 = vst [vmem:[#allocation2 + $0x3] sm:$0x1] %v102_v58  ;;  %v165_v16 = vld [vmem:[#allocation8 + $0x160] sm:$0xff]  ;;  %v333_v18 = vld [vmem:[#allocation9 + $0x8] sm:$0xff]  ;;  %v2783_v20 = vpack.c.bf16 %v166_v15, %v163_v13 }
  0x55   :  { %2770 = vmatprep.subr.bf16.mxu0 %v2769_v41  ;;  %2797 = vmatprep.subr.bf16.mxu1 %v3468_v5  ;;  %v110_v60 = vld [vmem:[%s109_s14] sm:$0x1]  ;;  %107 = vst [vmem:[#allocation2 + $0x4] sm:$0x1] %v106_v59  ;;  %v336_v19 = vld [vmem:[#allocation9 + $0x20] sm:$0xff]  ;;  %v334_v25 = vld [vmem:[#allocation9 + $0x10] sm:$0xff] }
  0x56   :  { %111 = vst [vmem:[#allocation2 + $0x5] sm:$0x1] %v110_v60  ;;  %v114_v62 = vld [vmem:[%s113_s15] sm:$0x1]  ;;  %v332_v22 = vld [vmem:[#allocation9] sm:$0xff]  ;;  %v3637_v23 = vpack.c.bf16 %v336_v19, %v333_v18  ;;  %v337_v26 = vld [vmem:[#allocation9 + $0x28] sm:$0xff] }
  0x57   :  { %v118_v63 = vld [vmem:[%s117_s24] sm:$0x1]  ;;  %115 = vst [vmem:[#allocation2 + $0x6] sm:$0x1] %v114_v62  ;;  %v342_v28 = vld [vmem:[#allocation9 + $0x50] sm:$0xff]  ;;  %v3641_v32 = vpack.c.bf16 %v337_v26, %v334_v25  ;;  %v341_v34 = vld [vmem:[#allocation9 + $0x48] sm:$0xff] }
  0x58   :  { %119 = vst [vmem:[#allocation2 + $0x7] sm:$0x1] %v118_v63  ;;  %2772 = vmatpush1.bf16.msra.mxu0 %v2771_v51  ;;  %2799 = vmatpush3.bf16.msra.mxu1 %v2798_v52  ;;  %v160_v4 = vld [vmem:[#allocation8 + $0x138] sm:$0xff]  ;;  %v338_v31 = vld [vmem:[#allocation9 + $0x30] sm:$0xff]  ;;  %v340_v35 = vld [vmem:[#allocation9 + $0x40] sm:$0xff] }
  0x59   :  { %2774 = vmatprep.subr.bf16.mxu0 %v2773_v57  ;;  %2800 = vmatprep.subr.bf16.mxu1 %v3468_v5  ;;  %v164_v9 = vld [vmem:[#allocation8 + $0x158] sm:$0xff]  ;;  %v2779_v11 = vpack.c.bf16 %v160_v4, %v157_v2  ;;  %v345_v37 = vld [vmem:[#allocation9 + $0x68] sm:$0xff]  ;;  %v348_v38 = vld [vmem:[#allocation9 + $0x80] sm:$0xff]  ;;  %v3648_v39 = vpack.c.bf16 %v341_v34, %v338_v31 }
  0x5a   :  { %v2781_v14 = vpack.c.bf16 %v167_v10, %v164_v9  ;;  %v168_v17 = vld [vmem:[#allocation8 + $0x178] sm:$0xff]  ;;  %v344_v40 = vld [vmem:[#allocation9 + $0x60] sm:$0xff]  ;;  %v3654_v42 = vpack.c.bf16 %v348_v38, %v345_v37  ;;  %v346_v44 = vld [vmem:[#allocation9 + $0x70] sm:$0xff] }
  0x5b   :  { %v2807_v21 = vpack.c.bf16 %v168_v17, %v165_v16  ;;  %v335_v24 = vld [vmem:[#allocation9 + $0x18] sm:$0xff]  ;;  %v349_v45 = vld [vmem:[#allocation9 + $0x88] sm:$0xff]  ;;  %v354_v47 = vld [vmem:[#allocation9 + $0xb0] sm:$0xff] }
  0x5c   :  { %2776 = vmatpush1.bf16.msra.mxu0 %v2775_v0  ;;  %2802 = vmatpush3.bf16.msra.mxu1 %v2801_v1  ;;  %v339_v27 = vld [vmem:[#allocation9 + $0x38] sm:$0xff]  ;;  %v3639_v30 = vpack.c.bf16 %v335_v24, %v332_v22  ;;  %v350_v49 = vld [vmem:[#allocation9 + $0x90] sm:$0xff]  ;;  %v3664_v50 = vpack.c.bf16 %v349_v45, %v346_v44  ;;  %v353_v52 = vld [vmem:[#allocation9 + $0xa8] sm:$0xff] }
  0x5d   :  { %2778 = vmatprep.subr.bf16.mxu0 %v2777_v3  ;;  %2803 = vmatprep.subr.bf16.mxu1 %v3468_v5  ;;  %v3644_v33 = vpack.c.bf16 %v342_v28, %v339_v27  ;;  %v343_v36 = vld [vmem:[#allocation9 + $0x58] sm:$0xff]  ;;  %v352_v53 = vld [vmem:[#allocation9 + $0xa0] sm:$0xff]  ;;  %v357_v55 = vld [vmem:[#allocation9 + $0xc8] sm:$0xff]  ;;  %v3671_v57 = vpack.c.bf16 %v353_v52, %v350_v49 }
  0x5e   :  { %v3651_v41 = vpack.c.bf16 %v343_v36, %v340_v35  ;;  %v347_v43 = vld [vmem:[#allocation9 + $0x78] sm:$0xff]  ;;  %v360_v56 = vld [vmem:[#allocation9 + $0xe0] sm:$0xff]  ;;  %v358_v62 = vld [vmem:[#allocation9 + $0xd0] sm:$0xff]  ;;  %v171_v36 = vlaneseq }
  0x5f   :  { %v120_v29 = vld [vmem:[#allocation2] sm:$0xff]  ;;  %v3661_v48 = vpack.c.bf16 %v347_v43, %v344_v40  ;;  %v356_v58 = vld [vmem:[#allocation9 + $0xc0] sm:$0xff]  ;;  %v3677_v60 = vpack.c.bf16 %v360_v56, %v357_v55  ;;  %v361_v63 = vld [vmem:[#allocation9 + $0xe8] sm:$0xff] }
  0x60   :  { %2780 = vmatpush1.bf16.msra.mxu0 %v2779_v11  ;;  %2805 = vmatpush3.bf16.msra.mxu1 %v2804_v12  ;;  %v351_v46 = vld [vmem:[#allocation9 + $0x98] sm:$0xff]  ;;  %v366_v1 = vld [vmem:[#allocation9 + $0x110] sm:$0xff]  ;;  %v3684_v4 = vpack.c.bf16 %v361_v63, %v358_v62  ;;  %v365_v7 = vld [vmem:[#allocation9 + $0x108] sm:$0xff]  ;;  %v172_v37 = vshrl.u32 %v171_v36, 7 }
  0x61   :  { %2782 = vmatprep.subr.bf16.mxu0 %v2781_v14  ;;  %2806 = vmatprep.subr.bf16.mxu1 %v3468_v5  ;;  %v3667_v51 = vpack.c.bf16 %v354_v47, %v351_v46  ;;  %v355_v54 = vld [vmem:[#allocation9 + $0xb8] sm:$0xff]  ;;  %v362_v3 = vld [vmem:[#allocation9 + $0xf0] sm:$0xff]  ;;  %v364_v9 = vld [vmem:[#allocation9 + $0x100] sm:$0xff] }
  0x62   :  { %v3674_v59 = vpack.c.bf16 %v355_v54, %v352_v53  ;;  %v359_v61 = vld [vmem:[#allocation9 + $0xd8] sm:$0xff]  ;;  %v369_v11 = vld [vmem:[#allocation9 + $0x128] sm:$0xff]  ;;  %v372_v12 = vld [vmem:[#allocation9 + $0x140] sm:$0xff]  ;;  %v3691_v13 = vpack.c.bf16 %v365_v7, %v362_v3  ;;  %v173_v38 = vsub.s32 0, %v172_v37  ;;  %v181_v40 = vsub.s32 2, %v172_v37 }
  0x63   :  { %v363_v0 = vld [vmem:[#allocation9 + $0xf8] sm:$0xff]  ;;  %v3681_v2 = vpack.c.bf16 %v359_v61, %v356_v58  ;;  %v368_v14 = vld [vmem:[#allocation9 + $0x120] sm:$0xff]  ;;  %v3697_v16 = vpack.c.bf16 %v372_v12, %v369_v11  ;;  %v370_v18 = vld [vmem:[#allocation9 + $0x130] sm:$0xff]  ;;  %v177_v44 = vsub.s32 1, %v172_v37 }
  0x64   :  { %2784 = vmatpush1.bf16.msra.mxu0 %v2783_v20  ;;  %2808 = vmatpush3.bf16.msra.mxu1 %v2807_v21  ;;  %v3687_v6 = vpack.c.bf16 %v366_v1, %v363_v0  ;;  %v367_v10 = vld [vmem:[#allocation9 + $0x118] sm:$0xff]  ;;  %v373_v19 = vld [vmem:[#allocation9 + $0x148] sm:$0xff]  ;;  %v378_v21 = vld [vmem:[#allocation9 + $0x170] sm:$0xff] }
  0x65   :  { %2810 = vmatprep.subr.bf16.mxu0 %v3637_v23  ;;  %2841 = vmatprep.subr.bf16.mxu1 %v3468_v5  ;;  %v3694_v15 = vpack.c.bf16 %v367_v10, %v364_v9  ;;  %v371_v17 = vld [vmem:[#allocation9 + $0x138] sm:$0xff]  ;;  %v374_v24 = vld [vmem:[#allocation9 + $0x150] sm:$0xff]  ;;  %v3704_v25 = vpack.c.bf16 %v373_v19, %v370_v18  ;;  %v377_v27 = vld [vmem:[#allocation9 + $0x168] sm:$0xff] }
  0x66   :  { %v375_v20 = vld [vmem:[#allocation9 + $0x158] sm:$0xff]  ;;  %v3701_v22 = vpack.c.bf16 %v371_v17, %v368_v14  ;;  %v376_v28 = vld [vmem:[#allocation9 + $0x160] sm:$0xff]  ;;  %v3711_v31 = vpack.c.bf16 %v377_v27, %v374_v24 }
  0x67   :  { %251 = vmatmul.mubr.f32.vlgmr.msra.gmra.mrb[0].mxu0 %v120_v29  ;;  %2436 = vmatmul.mubr.f32.vlgmr.msra.gmra.mrb[0].mxu1 %v120_v29  ;;  %v3707_v26 = vpack.c.bf16 %v378_v21, %v375_v20  ;;  %v379_v29 = vld [vmem:[#allocation9 + $0x178] sm:$0xff] }
  0x68   :  { %2812 = vmatpush1.bf16.msra.mxu0 %v3639_v30  ;;  %2843 = vmatpush3.bf16.msra.mxu1 %v3641_v32  ;;  %v3714_v34 = vpack.c.bf16 %v379_v29, %v376_v28  ;;  %v3722_v35 = vld [vmem:[%s4117_s8] sm:$0x1] }
  0x69   :  { %2814 = vmatprep.subr.bf16.mxu0 %v3644_v33  ;;  %2844 = vmatprep.subr.bf16.mxu1 %v3468_v5  ;;  %v169_v43 = vld [vmem:[%s4113_s4] sm:$0x7] }
  0x6a   :  { %444 = vmatprep.mubr.f32.mxu0 %v3469_v8  ;;  %2470 = vmatprep.mubr.msk.f32.mxu1 %vm3470_vm0, %v3469_v8  ;;  %v174_v45 = vrot.slane %v169_v43, %v173_v38  ;;  %v182_v46 = vrot.slane %v169_v43, %v181_v40  ;;  %v178_v47 = vrot.slane %v169_v43, %v177_v44  ;;  %v538_v17 = vld [vmem:[%s4114_s5] sm:$0x1] }
  0x6c   :  { %2816 = vmatpush1.bf16.msra.mxu0 %v3648_v39  ;;  %2846 = vmatpush3.bf16.msra.mxu1 %v3651_v41 }
  0x6d   :  { %2818 = vmatprep.subr.bf16.mxu0 %v3654_v42  ;;  %2847 = vmatprep.subr.bf16.mxu1 %v3468_v5 }
  0x70   :  { %2820 = vmatpush1.bf16.msra.mxu0 %v3661_v48  ;;  %2849 = vmatpush3.bf16.msra.mxu1 %v3664_v50 }
  0x71   :  { %2822 = vmatprep.subr.bf16.mxu0 %v3667_v51  ;;  %2850 = vmatprep.subr.bf16.mxu1 %v3468_v5 }
  0x74   :  { %2824 = vmatpush1.bf16.msra.mxu0 %v3671_v57  ;;  %2852 = vmatpush3.bf16.msra.mxu1 %v3674_v59 }
  0x75   :  { %2826 = vmatprep.subr.bf16.mxu0 %v3677_v60  ;;  %2853 = vmatprep.subr.bf16.mxu1 %v3468_v5 }
  0x78   :  { %2828 = vmatpush1.bf16.msra.mxu0 %v3681_v2  ;;  %2855 = vmatpush3.bf16.msra.mxu1 %v3684_v4 }
  0x79   :  { %2830 = vmatprep.subr.bf16.mxu0 %v3687_v6  ;;  %2856 = vmatprep.subr.bf16.mxu1 %v3468_v5 }
  0x7c   :  { %2832 = vmatpush1.bf16.msra.mxu0 %v3691_v13  ;;  %2858 = vmatpush3.bf16.msra.mxu1 %v3694_v15 }
  0x7d   :  { %2834 = vmatprep.subr.bf16.mxu0 %v3697_v16  ;;  %2859 = vmatprep.subr.bf16.mxu1 %v3468_v5 }
  0x80   :  { %2836 = vmatpush1.bf16.msra.mxu0 %v3701_v22  ;;  %2861 = vmatpush3.bf16.msra.mxu1 %v3704_v25 }
  0x81   :  { %2838 = vmatprep.subr.bf16.mxu0 %v3707_v26  ;;  %2862 = vmatprep.subr.bf16.mxu1 %v3468_v5 }
  0x84   :  { %2840 = vmatpush1.bf16.msra.mxu0 %v3711_v31  ;;  %2864 = vmatpush3.bf16.msra.mxu1 %v3714_v34 }
  0x85   :  { %2866 = vmatprep.subr.bf16.mxu0 %v3637_v23  ;;  %2897 = vmatprep.subr.bf16.mxu1 %v3468_v5 }
  0x87   :  { %445 = vmatmul.mubr.f32.vlgmr.msra.gmra.mrb[2].mxu0 %v3722_v35  ;;  %2471 = vmatmul.mubr.f32.vlgmr.msra.gmra.mrb[2].mxu1 %v3722_v35 }
  0x88   :  { %2868 = vmatpush1.bf16.msra.mxu0 %v3639_v30  ;;  %2899 = vmatpush3.bf16.msra.mxu1 %v3641_v32 }
  0x89   :  { %2870 = vmatprep.subr.bf16.mxu0 %v3644_v33  ;;  %2900 = vmatprep.subr.bf16.mxu1 %v3468_v5 }
  0x8a   :  { %663 = vmatprep.mubr.f32.mxu0 %v3469_v8  ;;  %2505 = vmatprep.mubr.msk.f32.mxu1 %vm3470_vm0, %v3469_v8 }
  0x8c   :  { %2872 = vmatpush1.bf16.msra.mxu0 %v3648_v39  ;;  %2902 = vmatpush3.bf16.msra.mxu1 %v3651_v41 }
  0x8d   :  { %2874 = vmatprep.subr.bf16.mxu0 %v3654_v42  ;;  %2903 = vmatprep.subr.bf16.mxu1 %v3468_v5 }
  0x90   :  { %2876 = vmatpush1.bf16.msra.mxu0 %v3661_v48  ;;  %2905 = vmatpush3.bf16.msra.mxu1 %v3664_v50 }
  0x91   :  { %2878 = vmatprep.subr.bf16.mxu0 %v3667_v51  ;;  %2906 = vmatprep.subr.bf16.mxu1 %v3468_v5 }
  0x94   :  { %2880 = vmatpush1.bf16.msra.mxu0 %v3671_v57  ;;  %2908 = vmatpush3.bf16.msra.mxu1 %v3674_v59 }
  0x95   :  { %2882 = vmatprep.subr.bf16.mxu0 %v3677_v60  ;;  %2909 = vmatprep.subr.bf16.mxu1 %v3468_v5 }
  0x98   :  { %2884 = vmatpush1.bf16.msra.mxu0 %v3681_v2  ;;  %2911 = vmatpush3.bf16.msra.mxu1 %v3684_v4 }
  0x99   :  { %2886 = vmatprep.subr.bf16.mxu0 %v3687_v6  ;;  %2912 = vmatprep.subr.bf16.mxu1 %v3468_v5 }
  0x9c   :  { %2888 = vmatpush1.bf16.msra.mxu0 %v3691_v13  ;;  %2914 = vmatpush3.bf16.msra.mxu1 %v3694_v15 }
  0x9d   :  { %2890 = vmatprep.subr.bf16.mxu0 %v3697_v16  ;;  %2915 = vmatprep.subr.bf16.mxu1 %v3468_v5 }
  0xa0   :  { %2892 = vmatpush1.bf16.msra.mxu0 %v3701_v22  ;;  %2917 = vmatpush3.bf16.msra.mxu1 %v3704_v25 }
  0xa1   :  { %2894 = vmatprep.subr.bf16.mxu0 %v3707_v26  ;;  %2918 = vmatprep.subr.bf16.mxu1 %v3468_v5 }
  0xa4   :  { %2896 = vmatpush1.bf16.msra.mxu0 %v3711_v31  ;;  %2920 = vmatpush3.bf16.msra.mxu1 %v3714_v34 }
  0xa5   :  { %2922 = vmatprep.subr.bf16.mxu0 %v3637_v23  ;;  %2953 = vmatprep.subr.bf16.mxu1 %v3468_v5 }
 0x13a   :  { %v252_v49 = vpop.f32.mrb[0].mxu0  ;;  %v323_v52 = vpop.f32.mrb[0].mxu1 }
 0x13b   :  { %v253_v53 = vadd.f32 %v252_v49, %v174_v45  ;;  %v254_v54 = vpop.f32.mrb[1].mxu0  ;;  %v324_v55 = vadd.f32 %v323_v52, %v182_v46  ;;  %v2437_v56 = vpop.f32.mrb[1].mxu1 }
 0x13c   :  { %v255_v58 = vadd.f32 %v254_v54, %v178_v47 }
 0x13d   :  { %327 = vst [vmem:[#allocation3] sm:$0xff] %v253_v53  ;;  %329 = vst [vmem:[#allocation3 + $0x10] sm:$0xff] %v324_v55 }
 0x13e   :  { %328 = vst [vmem:[#allocation3 + $0x8] sm:$0xff] %v255_v58 }
 0x145   :  { %v331_v61 = vld [vmem:[#allocation3] ss:$8 sm:$0x7] }
 0x146   :  { %v529_v9 = vrot.slane %v331_v61, 1  ;;  %v541_v21 = vrot.slane %v331_v61, 2 }
 0x15a   :  { %v446_v62 = vpop.f32.mrb[2].mxu0  ;;  %v517_v63 = vpop.f32.mrb[2].mxu1 }
 0x15b   :  { %v521_v0 = vadd.f32 %v446_v62, %v331_v61  ;;  %v448_v1 = vpop.f32.mrb[3].mxu0  ;;  %v2472_v3 = vpop.f32.mrb[3].mxu1  ;;  %v539_v18 = vadd.f32 %v538_v17, %v517_v63 }
 0x15c   :  { %v531_v10 = vadd.f32 %v529_v9, %v448_v1 }
 0x15d   :  { %v2216_v7 = vmul.f32 -1.442695, %v521_v0 }
 0x15e   :  { %v2217_v11 = vmul.f32 -1.442695, %v531_v10 }
 0x15f   :  { %3292 = vpow2.f32 %v2216_v7 }
 0x160   :  { %3294 = vpow2.f32 %v2217_v11 }
 0x169   :  { %v3293_v12 = vpop.eup %3292 }
 0x16a   :  { %v525_v14 = vadd.f32 1.0, %v3293_v12  ;;  %v3295_v19 = vpop.eup %3294 }
 0x16b   :  { %v535_v27 = vadd.f32 1.0, %v3295_v19 }
 0x16c   :  { %3296 = vrcp.f32 %v525_v14 }
 0x176   :  { %v3297_v20 = vpop.eup %3296 }
 0x177   :  { %v540_v24 = vmul.f32 %v3297_v20, %v539_v18 }
 0x179   :  { %v543_v28 = vadd.f32 %v541_v21, %v540_v24  ;;  %v1209_v21 = vld [vmem:[#allocation9 + $0x8] sm:$0xff]  ;;  %v1212_v24 = vld [vmem:[#allocation9 + $0x20] sm:$0xff] }
 0x17b   :  { %3298 = vtanh.f32 %v543_v28  ;;  %v1211_v28 = vld [vmem:[#allocation9 + $0x18] sm:$0xff] }
 0x17c   :  { %3300 = vrcp.f32 %v535_v27  ;;  %v3872_v27 = vpack.c.bf16 %v1212_v24, %v1209_v21 }
 0x185   :  { %v3299_v29 = vpop.eup %3298 }
 0x186   :  { %v545_v36 = vsub.f32 %v3722_v35, %v3299_v29  ;;  %v3301_v37 = vpop.eup %3300  ;;  %v550_v35 = vld [vmem:[#allocation3 + $0x1] ss:$8 sm:$0x7] }
 0x187   :  { %v748_v52 = vrot.slane %v550_v35, 1  ;;  %v760_v63 = vrot.slane %v550_v35, 2 }
 0x188   :  { %v546_v38 = vmul.f32 %v3301_v37, %v545_v36  ;;  %v1215_v36 = vld [vmem:[#allocation9 + $0x38] sm:$0xff] }
 0x18a   :  { %v3771_v40 = vadd.f32 %v3299_v29, %v546_v38  ;;  %v1214_v38 = vld [vmem:[#allocation9 + $0x30] sm:$0xff] }
 0x18c   :  { %548 = vst [vmem:[#allocation4] sm:$0x1] %v3771_v40  ;;  %664 = vmatmul.mubr.f32.vlgmr.msra.gmra.mrb[4].mxu0 %v3771_v40  ;;  %2506 = vmatmul.mubr.f32.vlgmr.msra.gmra.mrb[4].mxu1 %v3771_v40 }
 0x18d   :  { %2924 = vmatpush1.bf16.msra.mxu0 %v3639_v30  ;;  %2955 = vmatpush3.bf16.msra.mxu1 %v3641_v32 }
 0x18e   :  { %2926 = vmatprep.subr.bf16.mxu0 %v3644_v33  ;;  %2956 = vmatprep.subr.bf16.mxu1 %v3468_v5 }
 0x18f   :  { %882 = vmatprep.mubr.f32.mxu0 %v3469_v8  ;;  %2540 = vmatprep.mubr.msk.f32.mxu1 %vm3470_vm0, %v3469_v8 }
 0x191   :  { %2928 = vmatpush1.bf16.msra.mxu0 %v3648_v39  ;;  %2958 = vmatpush3.bf16.msra.mxu1 %v3651_v41 }
 0x192   :  { %2930 = vmatprep.subr.bf16.mxu0 %v3654_v42  ;;  %2959 = vmatprep.subr.bf16.mxu1 %v3468_v5 }
 0x195   :  { %2932 = vmatpush1.bf16.msra.mxu0 %v3661_v48  ;;  %2961 = vmatpush3.bf16.msra.mxu1 %v3664_v50 }
 0x196   :  { %2934 = vmatprep.subr.bf16.mxu0 %v3667_v51  ;;  %2962 = vmatprep.subr.bf16.mxu1 %v3468_v5 }
 0x199   :  { %2936 = vmatpush1.bf16.msra.mxu0 %v3671_v57  ;;  %2964 = vmatpush3.bf16.msra.mxu1 %v3674_v59 }
 0x19a   :  { %2938 = vmatprep.subr.bf16.mxu0 %v3677_v60  ;;  %2965 = vmatprep.subr.bf16.mxu1 %v3468_v5 }
 0x19d   :  { %2940 = vmatpush1.bf16.msra.mxu0 %v3681_v2  ;;  %2967 = vmatpush3.bf16.msra.mxu1 %v3684_v4 }
 0x19e   :  { %2942 = vmatprep.subr.bf16.mxu0 %v3687_v6  ;;  %2968 = vmatprep.subr.bf16.mxu1 %v3468_v5 }
 0x1a1   :  { %2944 = vmatpush1.bf16.msra.mxu0 %v3691_v13  ;;  %2970 = vmatpush3.bf16.msra.mxu1 %v3694_v15 }
 0x1a2   :  { %2946 = vmatprep.subr.bf16.mxu0 %v3697_v16  ;;  %2971 = vmatprep.subr.bf16.mxu1 %v3468_v5 }
 0x1a5   :  { %2948 = vmatpush1.bf16.msra.mxu0 %v3701_v22  ;;  %2973 = vmatpush3.bf16.msra.mxu1 %v3704_v25 }
 0x1a6   :  { %2950 = vmatprep.subr.bf16.mxu0 %v3707_v26  ;;  %2974 = vmatprep.subr.bf16.mxu1 %v3468_v5 }
 0x1a9   :  { %2952 = vmatpush1.bf16.msra.mxu0 %v3711_v31  ;;  %2976 = vmatpush3.bf16.msra.mxu1 %v3714_v34 }
 0x1aa   :  { %2978 = vmatprep.subr.bf16.mxu0 %v3637_v23  ;;  %3009 = vmatprep.subr.bf16.mxu1 %v3468_v5  ;;  %v757_v23 = vld [vmem:[%s4114_s5] sm:$0x1] }
 0x25f   :  { %v665_v43 = vpop.f32.mrb[4].mxu0  ;;  %v736_v44 = vpop.f32.mrb[4].mxu1 }
 0x260   :  { %v740_v45 = vadd.f32 %v665_v43, %v550_v35  ;;  %v667_v46 = vpop.f32.mrb[5].mxu0  ;;  %v2507_v47 = vpop.f32.mrb[5].mxu1  ;;  %v758_v61 = vadd.f32 %v757_v23, %v736_v44  ;;  %v1221_v35 = vld [vmem:[#allocation9 + $0x68] sm:$0xff]  ;;  %v1224_v43 = vld [vmem:[#allocation9 + $0x80] sm:$0xff] }
 0x261   :  { %v750_v53 = vadd.f32 %v748_v52, %v667_v46  ;;  %v3884_v44 = vpack.c.bf16 %v1224_v43, %v1221_v35  ;;  %v1223_v46 = vld [vmem:[#allocation9 + $0x78] sm:$0xff]  ;;  %v1230_v52 = vld [vmem:[#allocation9 + $0xb0] sm:$0xff] }
 0x262   :  { %v2218_v49 = vmul.f32 -1.442695, %v740_v45  ;;  %v1220_v45 = vld [vmem:[#allocation9 + $0x60] sm:$0xff] }
 0x263   :  { %v2219_v54 = vmul.f32 -1.442695, %v750_v53  ;;  %v3886_v47 = vpack.c.bf16 %v1223_v46, %v1220_v45 }
 0x264   :  { %3302 = vpow2.f32 %v2218_v49  ;;  %v1227_v49 = vld [vmem:[#allocation9 + $0x98] sm:$0xff] }
 0x265   :  { %3304 = vpow2.f32 %v2219_v54  ;;  %v3890_v53 = vpack.c.bf16 %v1230_v52, %v1227_v49  ;;  %v1226_v54 = vld [vmem:[#allocation9 + $0x90] sm:$0xff] }
 0x26e   :  { %v3303_v55 = vpop.eup %3302 }
 0x26f   :  { %v744_v56 = vadd.f32 1.0, %v3303_v55  ;;  %v3305_v58 = vpop.eup %3304  ;;  %v1229_v55 = vld [vmem:[#allocation9 + $0xa8] sm:$0xff] }
 0x270   :  { %v754_v3 = vadd.f32 1.0, %v3305_v58  ;;  %v3892_v23 = vpack.c.bf16 %v1229_v55, %v1226_v54  ;;  %v1231_v58 = vld [vmem:[#allocation9 + $0xb8] sm:$0xff] }
 0x271   :  { %3306 = vrcp.f32 %v744_v56  ;;  %v1228_v56 = vld [vmem:[#allocation9 + $0xa0] sm:$0xff]  ;;  %v1195_v54 = vld [vmem:[%s4114_s5] sm:$0x1] }
 0x27b   :  { %v3307_v62 = vpop.eup %3306 }
 0x27c   :  { %v759_v0 = vmul.f32 %v3307_v62, %v758_v61  ;;  %v3895_v61 = vpack.c.bf16 %v1231_v58, %v1228_v56  ;;  %v1233_v62 = vld [vmem:[#allocation9 + $0xc8] sm:$0xff] }
 0x27e   :  { %v762_v1 = vadd.f32 %v760_v63, %v759_v0  ;;  %v1236_v63 = vld [vmem:[#allocation9 + $0xe0] sm:$0xff] }
 0x27f   :  { %v1232_v0 = vld [vmem:[#allocation9 + $0xc0] sm:$0xff] }
 0x280   :  { %3308 = vtanh.f32 %v762_v1  ;;  %v3899_v1 = vpack.c.bf16 %v1236_v63, %v1233_v62 }
 0x281   :  { %3310 = vrcp.f32 %v754_v3  ;;  %v1235_v3 = vld [vmem:[#allocation9 + $0xd8] sm:$0xff] }
 0x28a   :  { %v3309_v7 = vpop.eup %3308 }
 0x28b   :  { %v764_v9 = vsub.f32 %v3771_v40, %v3309_v7  ;;  %v3311_v10 = vpop.eup %3310 }
 0x28d   :  { %v765_v11 = vmul.f32 %v3311_v10, %v764_v9  ;;  %v1237_v9 = vld [vmem:[#allocation9 + $0xe8] sm:$0xff]  ;;  %v3902_v10 = vpack.c.bf16 %v1235_v3, %v1232_v0 }
 0x28f   :  { %v3815_v12 = vadd.f32 %v3309_v7, %v765_v11  ;;  %v1234_v7 = vld [vmem:[#allocation9 + $0xd0] sm:$0xff] }
 0x290   :  { %v3904_v11 = vpack.c.bf16 %v1237_v9, %v1234_v7 }
 0x291   :  { %767 = vst [vmem:[#allocation4 + $0x1] sm:$0x1] %v3815_v12  ;;  %883 = vmatmul.mubr.f32.vlgmr.msra.gmra.mrb[6].mxu0 %v3815_v12  ;;  %2541 = vmatmul.mubr.f32.vlgmr.msra.gmra.mrb[6].mxu1 %v3815_v12 }
 0x292   :  { %2980 = vmatpush1.bf16.msra.mxu0 %v3639_v30  ;;  %3011 = vmatpush3.bf16.msra.mxu1 %v3641_v32  ;;  %v769_v30 = vld [vmem:[#allocation3 + $0x2] ss:$8 sm:$0x7] }
 0x293   :  { %2982 = vmatprep.subr.bf16.mxu0 %v3644_v33  ;;  %3012 = vmatprep.subr.bf16.mxu1 %v3468_v5 }
 0x294   :  { %1101 = vmatprep.mubr.f32.mxu0 %v3469_v8  ;;  %2575 = vmatprep.mubr.msk.f32.mxu1 %vm3470_vm0, %v3469_v8 }
 0x296   :  { %2984 = vmatpush1.bf16.msra.mxu0 %v3648_v39  ;;  %3014 = vmatpush3.bf16.msra.mxu1 %v3651_v41 }
 0x297   :  { %2986 = vmatprep.subr.bf16.mxu0 %v3654_v42  ;;  %3015 = vmatprep.subr.bf16.mxu1 %v3468_v5 }
 0x29a   :  { %2988 = vmatpush1.bf16.msra.mxu0 %v3661_v48  ;;  %3017 = vmatpush3.bf16.msra.mxu1 %v3664_v50 }
 0x29b   :  { %2990 = vmatprep.subr.bf16.mxu0 %v3667_v51  ;;  %3018 = vmatprep.subr.bf16.mxu1 %v3468_v5 }
 0x29e   :  { %2992 = vmatpush1.bf16.msra.mxu0 %v3671_v57  ;;  %3020 = vmatpush3.bf16.msra.mxu1 %v3674_v59  ;;  %v967_v59 = vrot.slane %v769_v30, 1 }
 0x29f   :  { %2994 = vmatprep.subr.bf16.mxu0 %v3677_v60  ;;  %3021 = vmatprep.subr.bf16.mxu1 %v3468_v5 }
 0x2a2   :  { %2996 = vmatpush1.bf16.msra.mxu0 %v3681_v2  ;;  %3023 = vmatpush3.bf16.msra.mxu1 %v3684_v4 }
 0x2a3   :  { %2998 = vmatprep.subr.bf16.mxu0 %v3687_v6  ;;  %3024 = vmatprep.subr.bf16.mxu1 %v3468_v5 }
 0x2a6   :  { %3000 = vmatpush1.bf16.msra.mxu0 %v3691_v13  ;;  %3026 = vmatpush3.bf16.msra.mxu1 %v3694_v15  ;;  %v976_v13 = vld [vmem:[%s4114_s5] sm:$0x1] }
 0x2a7   :  { %3002 = vmatprep.subr.bf16.mxu0 %v3697_v16  ;;  %3027 = vmatprep.subr.bf16.mxu1 %v3468_v5 }
 0x2aa   :  { %3004 = vmatpush1.bf16.msra.mxu0 %v3701_v22  ;;  %3029 = vmatpush3.bf16.msra.mxu1 %v3704_v25  ;;  %v979_v25 = vrot.slane %v769_v30, 2 }
 0x2ab   :  { %3006 = vmatprep.subr.bf16.mxu0 %v3707_v26  ;;  %3030 = vmatprep.subr.bf16.mxu1 %v3468_v5 }
 0x2ae   :  { %3008 = vmatpush1.bf16.msra.mxu0 %v3711_v31  ;;  %3032 = vmatpush3.bf16.msra.mxu1 %v3714_v34 }
 0x2af   :  { %3065 = vmatprep.subr.bf16.mxu1 %v3468_v5  ;;  %3034 = vmatprep.subr.bf16.mxu0 %v3872_v27 }
 0x364   :  { %v884_v33 = vpop.f32.mrb[6].mxu0  ;;  %v955_v39 = vpop.f32.mrb[6].mxu1 }
 0x365   :  { %v959_v42 = vadd.f32 %v884_v33, %v769_v30  ;;  %v886_v48 = vpop.f32.mrb[7].mxu0  ;;  %v2542_v51 = vpop.f32.mrb[7].mxu1  ;;  %v977_v16 = vadd.f32 %v976_v13, %v955_v39  ;;  %v1242_v30 = vld [vmem:[#allocation9 + $0x110] sm:$0xff]  ;;  %v1247_v13 = vld [vmem:[#allocation9 + $0x138] sm:$0xff] }
 0x366   :  { %v969_v60 = vadd.f32 %v967_v59, %v886_v48  ;;  %v1238_v33 = vld [vmem:[#allocation9 + $0xf0] sm:$0xff]  ;;  %v1240_v48 = vld [vmem:[#allocation9 + $0x100] sm:$0xff]  ;;  %v1243_v51 = vld [vmem:[#allocation9 + $0x118] sm:$0xff] }
 0x367   :  { %v2220_v57 = vmul.f32 -1.442695, %v959_v42  ;;  %v1241_v42 = vld [vmem:[#allocation9 + $0x108] sm:$0xff] }
 0x368   :  { %v2221_v2 = vmul.f32 -1.442695, %v969_v60  ;;  %v1245_v59 = vld [vmem:[#allocation9 + $0x128] sm:$0xff]  ;;  %v1248_v60 = vld [vmem:[#allocation9 + $0x140] sm:$0xff] }
 0x369   :  { %3312 = vpow2.f32 %v2220_v57  ;;  %v3910_v57 = vpack.c.bf16 %v1241_v42, %v1238_v33  ;;  %v1432_v42 = vld [vmem:[#allocation9 + $0x28] sm:$0xff] }
 0x36a   :  { %3314 = vpow2.f32 %v2221_v2  ;;  %v3914_v2 = vpack.c.bf16 %v1243_v51, %v1240_v48  ;;  %v1435_v51 = vld [vmem:[#allocation9 + $0x40] sm:$0xff] }
 0x373   :  { %v3313_v4 = vpop.eup %3312 }
 0x374   :  { %v963_v6 = vadd.f32 1.0, %v3313_v4  ;;  %v3315_v15 = vpop.eup %3314  ;;  %v3916_v4 = vpack.c.bf16 %v1248_v60, %v1245_v59  ;;  %v1438_v59 = vld [vmem:[#allocation9 + $0x58] sm:$0xff] }
 0x375   :  { %v973_v34 = vadd.f32 1.0, %v3315_v15  ;;  %v1246_v15 = vld [vmem:[#allocation9 + $0x130] sm:$0xff]  ;;  %v3973_v60 = vpack.c.bf16 %v1438_v59, %v1435_v51 }
 0x376   :  { %3316 = vrcp.f32 %v963_v6  ;;  %v1244_v6 = vld [vmem:[#allocation9 + $0x120] sm:$0xff] }
 0x380   :  { %v3317_v22 = vpop.eup %3316 }
 0x381   :  { %v978_v26 = vmul.f32 %v3317_v22, %v977_v16  ;;  %v1249_v16 = vld [vmem:[#allocation9 + $0x148] sm:$0xff]  ;;  %v1251_v22 = vld [vmem:[#allocation9 + $0x158] sm:$0xff] }
 0x383   :  { %v981_v31 = vadd.f32 %v979_v25, %v978_v26  ;;  %v1254_v25 = vld [vmem:[#allocation9 + $0x170] sm:$0xff]  ;;  %v3920_v26 = vpack.c.bf16 %v1247_v13, %v1244_v6  ;;  %v1444_v13 = vld [vmem:[#allocation9 + $0x88] sm:$0xff] }
 0x384   :  { %v1441_v6 = vld [vmem:[#allocation9 + $0x70] sm:$0xff] }
 0x385   :  { %3318 = vtanh.f32 %v981_v31  ;;  %v3924_v31 = vpack.c.bf16 %v1249_v16, %v1246_v15  ;;  %v3977_v15 = vpack.c.bf16 %v1444_v13, %v1441_v6  ;;  %v1207_v16 = vld [vmem:[#allocation3 + $0x4] ss:$8 sm:$0x7] }
 0x386   :  { %3320 = vrcp.f32 %v973_v34  ;;  %v3926_v34 = vpack.c.bf16 %v1254_v25, %v1251_v22 }
 0x38f   :  { %v3319_v14 = vpop.eup %3318 }
 0x390   :  { %v983_v17 = vsub.f32 %v3815_v12, %v3319_v14  ;;  %v3321_v18 = vpop.eup %3320  ;;  %v1239_v12 = vld [vmem:[#allocation9 + $0xf8] sm:$0xff] }
 0x391   :  { %v3907_v39 = vpack.c.bf16 %v1242_v30, %v1239_v12 }
 0x392   :  { %v984_v19 = vmul.f32 %v3321_v18, %v983_v17  ;;  %v1253_v17 = vld [vmem:[#allocation9 + $0x168] sm:$0xff]  ;;  %v1252_v18 = vld [vmem:[#allocation9 + $0x160] sm:$0xff] }
 0x394   :  { %v3858_v20 = vadd.f32 %v3319_v14, %v984_v19  ;;  %v1250_v14 = vld [vmem:[#allocation9 + $0x150] sm:$0xff]  ;;  %v1255_v19 = vld [vmem:[#allocation9 + $0x178] sm:$0xff] }
 0x395   :  { %v3930_v21 = vpack.c.bf16 %v1253_v17, %v1250_v14  ;;  %v3934_v24 = vpack.c.bf16 %v1255_v19, %v1252_v18 }
 0x396   :  { %986 = vst [vmem:[#allocation4 + $0x2] sm:$0x1] %v3858_v20  ;;  %1102 = vmatmul.mubr.f32.vlgmr.msra.gmra.mrb[8].mxu0 %v3858_v20  ;;  %2576 = vmatmul.mubr.f32.vlgmr.msra.gmra.mrb[8].mxu1 %v3858_v20 }
 0x397   :  { %3067 = vmatpush3.bf16.msra.mxu1 %v3641_v32  ;;  %1320 = vmatprep.mubr.f32.mxu0 %v3469_v8  ;;  %v1208_v32 = vld [vmem:[#allocation9] sm:$0xff] }
 0x398   :  { %3068 = vmatprep.subr.bf16.mxu1 %v3468_v5  ;;  %2610 = vmatprep.mubr.msk.f32.mxu1 %vm3470_vm0, %v3469_v8  ;;  %v3874_v29 = vpack.c.bf16 %v1211_v28, %v1208_v32  ;;  %v988_v32 = vld [vmem:[#allocation3 + $0x3] ss:$8 sm:$0x7] }
 0x399   :  { %v1186_v43 = vrot.slane %v988_v32, 1  ;;  %v1198_v62 = vrot.slane %v988_v32, 2 }
 0x39a   :  { %3036 = vmatpush1.bf16.msra.mxu0 %v3874_v29 }
 0x39b   :  { %3070 = vmatpush3.bf16.msra.mxu1 %v3651_v41  ;;  %v1218_v41 = vld [vmem:[#allocation9 + $0x50] sm:$0xff] }
 0x39c   :  { %3071 = vmatprep.subr.bf16.mxu1 %v3468_v5  ;;  %v3878_v37 = vpack.c.bf16 %v1218_v41, %v1215_v36 }
 0x39e   :  { %3038 = vmatprep.subr.bf16.mxu0 %v3878_v37 }
 0x39f   :  { %3073 = vmatpush3.bf16.msra.mxu1 %v3664_v50  ;;  %v1217_v50 = vld [vmem:[#allocation9 + $0x48] sm:$0xff] }
 0x3a0   :  { %3074 = vmatprep.subr.bf16.mxu1 %v3468_v5  ;;  %v3880_v40 = vpack.c.bf16 %v1217_v50, %v1214_v38 }
 0x3a2   :  { %3040 = vmatpush1.bf16.msra.mxu0 %v3880_v40 }
 0x3a3   :  { %3042 = vmatprep.subr.bf16.mxu0 %v3884_v44  ;;  %3076 = vmatpush3.bf16.msra.mxu1 %v3895_v61 }
 0x3a4   :  { %3077 = vmatprep.subr.bf16.mxu1 %v3468_v5 }
 0x3a6   :  { %3044 = vmatpush1.bf16.msra.mxu0 %v3886_v47 }
 0x3a7   :  { %3046 = vmatprep.subr.bf16.mxu0 %v3890_v53  ;;  %3079 = vmatpush3.bf16.msra.mxu1 %v3904_v11 }
 0x3a8   :  { %3080 = vmatprep.subr.bf16.mxu1 %v3468_v5 }
 0x3aa   :  { %3048 = vmatpush1.bf16.msra.mxu0 %v3892_v23 }
 0x3ab   :  { %3050 = vmatprep.subr.bf16.mxu0 %v3899_v1  ;;  %3082 = vmatpush3.bf16.msra.mxu1 %v3914_v2 }
 0x3ac   :  { %3083 = vmatprep.subr.bf16.mxu1 %v3468_v5 }
 0x3ae   :  { %3052 = vmatpush1.bf16.msra.mxu0 %v3902_v10 }
 0x3af   :  { %3054 = vmatprep.subr.bf16.mxu0 %v3907_v39  ;;  %3085 = vmatpush3.bf16.msra.mxu1 %v3924_v31 }
 0x3b0   :  { %3086 = vmatprep.subr.bf16.mxu1 %v3468_v5 }
 0x3b2   :  { %3056 = vmatpush1.bf16.msra.mxu0 %v3910_v57 }
 0x3b3   :  { %3058 = vmatprep.subr.bf16.mxu0 %v3916_v4  ;;  %3088 = vmatpush3.bf16.msra.mxu1 %v3934_v24 }
 0x3b4   :  { %3121 = vmatprep.subr.bf16.mxu1 %v3468_v5 }
 0x3b6   :  { %3060 = vmatpush1.bf16.msra.mxu0 %v3920_v26 }
 0x3b7   :  { %3062 = vmatprep.subr.bf16.mxu0 %v3926_v34 }
 0x3ba   :  { %3064 = vmatpush1.bf16.msra.mxu0 %v3930_v21 }
 0x3bb   :  { %3090 = vmatprep.subr.bf16.mxu0 %v3872_v27 }
 0x469   :  { %v1103_v28 = vpop.f32.mrb[8].mxu0  ;;  %v1174_v36 = vpop.f32.mrb[8].mxu1 }
 0x46a   :  { %v1178_v41 = vadd.f32 %v1103_v28, %v988_v32  ;;  %v1105_v38 = vpop.f32.mrb[9].mxu0  ;;  %v2577_v50 = vpop.f32.mrb[9].mxu1  ;;  %v1196_v56 = vadd.f32 %v1195_v54, %v1174_v36  ;;  %v1405_v32 = vrot.slane %v1207_v16, 1 }
 0x46b   :  { %v1188_v45 = vadd.f32 %v1186_v43, %v1105_v38  ;;  %v1414_v50 = vld [vmem:[%s4114_s5] sm:$0x1] }
 0x46c   :  { %v2222_v35 = vmul.f32 -1.442695, %v1178_v41 }
 0x46d   :  { %v2223_v46 = vmul.f32 -1.442695, %v1188_v45 }
 0x46e   :  { %3322 = vpow2.f32 %v2222_v35 }
 0x46f   :  { %3324 = vpow2.f32 %v2223_v46  ;;  %v1417_v46 = vrot.slane %v1207_v16, 2 }
 0x478   :  { %v3323_v49 = vpop.eup %3322 }
 0x479   :  { %v1182_v52 = vadd.f32 1.0, %v3323_v49  ;;  %v3325_v55 = vpop.eup %3324 }
 0x47a   :  { %v1192_v3 = vadd.f32 1.0, %v3325_v55 }
 0x47b   :  { %3326 = vrcp.f32 %v1182_v52 }
 0x485   :  { %v3327_v58 = vpop.eup %3326 }
 0x486   :  { %v1197_v63 = vmul.f32 %v3327_v58, %v1196_v56 }
 0x488   :  { %v1200_v0 = vadd.f32 %v1198_v62, %v1197_v63 }
 0x48a   :  { %3328 = vtanh.f32 %v1200_v0  ;;  %v1426_v0 = vld [vmem:[#allocation3 + $0x5] ss:$8 sm:$0x7] }
 0x48b   :  { %3330 = vrcp.f32 %v1192_v3 }
 0x494   :  { %v3329_v7 = vpop.eup %3328 }
 0x495   :  { %v1202_v9 = vsub.f32 %v3858_v20, %v3329_v7  ;;  %v3331_v12 = vpop.eup %3330  ;;  %v1429_v20 = vld [vmem:[#allocation9 + $0x10] sm:$0xff] }
 0x496   :  { %v3969_v48 = vpack.c.bf16 %v1432_v42, %v1429_v20  ;;  %v1624_v20 = vrot.slane %v1426_v0, 1 }
 0x497   :  { %v1203_v30 = vmul.f32 %v3331_v12, %v1202_v9 }
 0x499   :  { %v3945_v33 = vadd.f32 %v3329_v7, %v1203_v30 }
 0x49b   :  { %1205 = vst [vmem:[#allocation4 + $0x3] sm:$0x1] %v3945_v33  ;;  %1321 = vmatmul.mubr.f32.vlgmr.msra.gmra.mrb[10].mxu0 %v3945_v33  ;;  %2611 = vmatmul.mubr.f32.vlgmr.msra.gmra.mrb[10].mxu1 %v3945_v33 }
 0x49c   :  { %3092 = vmatpush1.bf16.msra.mxu0 %v3874_v29  ;;  %1539 = vmatprep.mubr.f32.mxu0 %v3469_v8 }
 0x49d   :  { %3094 = vmatprep.subr.bf16.mxu0 %v3878_v37  ;;  %2645 = vmatprep.mubr.msk.f32.mxu1 %vm3470_vm0, %v3469_v8 }
 0x49e   :  { %3123 = vmatpush3.bf16.msra.mxu1 %v3969_v48 }
 0x49f   :  { %3124 = vmatprep.subr.bf16.mxu1 %v3468_v5 }
 0x4a0   :  { %3096 = vmatpush1.bf16.msra.mxu0 %v3880_v40 }
 0x4a1   :  { %3098 = vmatprep.subr.bf16.mxu0 %v3884_v44 }
 0x4a2   :  { %3126 = vmatpush3.bf16.msra.mxu1 %v3973_v60 }
 0x4a3   :  { %3127 = vmatprep.subr.bf16.mxu1 %v3468_v5 }
 0x4a4   :  { %3100 = vmatpush1.bf16.msra.mxu0 %v3886_v47 }
 0x4a5   :  { %3102 = vmatprep.subr.bf16.mxu0 %v3890_v53 }
 0x4a6   :  { %3129 = vmatpush3.bf16.msra.mxu1 %v3977_v15 }
 0x4a7   :  { %3130 = vmatprep.subr.bf16.mxu1 %v3468_v5 }
 0x4a8   :  { %3104 = vmatpush1.bf16.msra.mxu0 %v3892_v23 }
 0x4a9   :  { %3106 = vmatprep.subr.bf16.mxu0 %v3899_v1 }
 0x4aa   :  { %3132 = vmatpush3.bf16.msra.mxu1 %v3895_v61 }
 0x4ab   :  { %3133 = vmatprep.subr.bf16.mxu1 %v3468_v5 }
 0x4ac   :  { %3108 = vmatpush1.bf16.msra.mxu0 %v3902_v10 }
 0x4ad   :  { %3110 = vmatprep.subr.bf16.mxu0 %v3907_v39 }
 0x4ae   :  { %3135 = vmatpush3.bf16.msra.mxu1 %v3904_v11 }
 0x4af   :  { %3136 = vmatprep.subr.bf16.mxu1 %v3468_v5 }
 0x4b0   :  { %3112 = vmatpush1.bf16.msra.mxu0 %v3910_v57 }
 0x4b1   :  { %3114 = vmatprep.subr.bf16.mxu0 %v3916_v4 }
 0x4b2   :  { %3138 = vmatpush3.bf16.msra.mxu1 %v3914_v2 }
 0x4b3   :  { %3139 = vmatprep.subr.bf16.mxu1 %v3468_v5 }
 0x4b4   :  { %3116 = vmatpush1.bf16.msra.mxu0 %v3920_v26 }
 0x4b5   :  { %3118 = vmatprep.subr.bf16.mxu0 %v3926_v34 }
 0x4b6   :  { %3141 = vmatpush3.bf16.msra.mxu1 %v3924_v31 }
 0x4b7   :  { %3142 = vmatprep.subr.bf16.mxu1 %v3468_v5 }
 0x4b8   :  { %3120 = vmatpush1.bf16.msra.mxu0 %v3930_v21 }
 0x4b9   :  { %3146 = vmatprep.subr.bf16.mxu0 %v3872_v27 }
 0x4ba   :  { %3144 = vmatpush3.bf16.msra.mxu1 %v3934_v24 }
 0x4bb   :  { %3177 = vmatprep.subr.bf16.mxu1 %v3468_v5 }
 0x56e   :  { %v1322_v22 = vpop.f32.mrb[10].mxu0  ;;  %v1393_v25 = vpop.f32.mrb[10].mxu1 }
 0x56f   :  { %v1397_v14 = vadd.f32 %v1322_v22, %v1207_v16  ;;  %v1324_v17 = vpop.f32.mrb[11].mxu0  ;;  %v2612_v18 = vpop.f32.mrb[11].mxu1  ;;  %v1415_v43 = vadd.f32 %v1414_v50, %v1393_v25  ;;  %v1636_v25 = vrot.slane %v1426_v0, 2 }
 0x570   :  { %v1407_v28 = vadd.f32 %v1405_v32, %v1324_v17 }
 0x571   :  { %v2224_v19 = vmul.f32 -1.442695, %v1397_v14 }
 0x572   :  { %v2225_v36 = vmul.f32 -1.442695, %v1407_v28 }
 0x573   :  { %3332 = vpow2.f32 %v2224_v19 }
 0x574   :  { %3334 = vpow2.f32 %v2225_v36 }
 0x57d   :  { %v3333_v41 = vpop.eup %3332 }
 0x57e   :  { %v1401_v38 = vadd.f32 1.0, %v3333_v41  ;;  %v3335_v35 = vpop.eup %3334 }
 0x57f   :  { %v1411_v54 = vadd.f32 1.0, %v3335_v35  ;;  %v2084_v35 = vld [vmem:[#allocation11] sm:$0xff] }
 0x580   :  { %3336 = vrcp.f32 %v1401_v38 }
 0x58a   :  { %v3337_v45 = vpop.eup %3336 }
 0x58b   :  { %v1416_v49 = vmul.f32 %v3337_v45, %v1415_v43  ;;  %v2085_v43 = vld [vmem:[#allocation11 + $0x8] sm:$0xff] }
 0x58c   :  { %v3258_v45 = vpack.c.bf16 %v2085_v43, %v2084_v35 }
 0x58d   :  { %v1419_v52 = vadd.f32 %v1417_v46, %v1416_v49  ;;  %v2086_v46 = vld [vmem:[#allocation11 + $0x10] sm:$0xff]  ;;  %v2087_v49 = vld [vmem:[#allocation11 + $0x18] sm:$0xff] }
 0x58f   :  { %3338 = vtanh.f32 %v1419_v52  ;;  %v3261_v52 = vpack.c.bf16 %v2087_v49, %v2086_v46 }
 0x590   :  { %3340 = vrcp.f32 %v1411_v54  ;;  %v2088_v54 = vld [vmem:[#allocation11 + $0x20] sm:$0xff] }
 0x599   :  { %v3339_v55 = vpop.eup %3338 }
 0x59a   :  { %v1421_v56 = vsub.f32 %v3945_v33, %v3339_v55  ;;  %v3341_v58 = vpop.eup %3340 }
 0x59c   :  { %v1422_v62 = vmul.f32 %v3341_v58, %v1421_v56  ;;  %v2090_v58 = vld [vmem:[#allocation11 + $0x30] sm:$0xff] }
 0x59e   :  { %v3995_v63 = vadd.f32 %v3339_v55, %v1422_v62  ;;  %v2089_v55 = vld [vmem:[#allocation11 + $0x28] sm:$0xff] }
 0x59f   :  { %v3264_v56 = vpack.c.bf16 %v2089_v55, %v2088_v54 }
 0x5a0   :  { %1424 = vst [vmem:[#allocation4 + $0x4] sm:$0x1] %v3995_v63  ;;  %1540 = vmatmul.mubr.f32.vlgmr.msra.gmra.mrb[12].mxu0 %v3995_v63  ;;  %2646 = vmatmul.mubr.f32.vlgmr.msra.gmra.mrb[12].mxu1 %v3995_v63 }
 0x5a1   :  { %3148 = vmatpush1.bf16.msra.mxu0 %v3874_v29  ;;  %3179 = vmatpush3.bf16.msra.mxu1 %v3969_v48 }
 0x5a2   :  { %3150 = vmatprep.subr.bf16.mxu0 %v3878_v37  ;;  %3180 = vmatprep.subr.bf16.mxu1 %v3468_v5 }
 0x5a3   :  { %1758 = vmatprep.mubr.f32.mxu0 %v3469_v8  ;;  %2680 = vmatprep.mubr.msk.f32.mxu1 %vm3470_vm0, %v3469_v8 }
 0x5a5   :  { %3152 = vmatpush1.bf16.msra.mxu0 %v3880_v40  ;;  %3182 = vmatpush3.bf16.msra.mxu1 %v3973_v60 }
 0x5a6   :  { %3154 = vmatprep.subr.bf16.mxu0 %v3884_v44  ;;  %3183 = vmatprep.subr.bf16.mxu1 %v3468_v5 }
 0x5a9   :  { %3156 = vmatpush1.bf16.msra.mxu0 %v3886_v47  ;;  %3185 = vmatpush3.bf16.msra.mxu1 %v3977_v15 }
 0x5aa   :  { %3158 = vmatprep.subr.bf16.mxu0 %v3890_v53  ;;  %3186 = vmatprep.subr.bf16.mxu1 %v3468_v5 }
 0x5ad   :  { %3160 = vmatpush1.bf16.msra.mxu0 %v3892_v23  ;;  %3188 = vmatpush3.bf16.msra.mxu1 %v3895_v61 }
 0x5ae   :  { %3162 = vmatprep.subr.bf16.mxu0 %v3899_v1  ;;  %3189 = vmatprep.subr.bf16.mxu1 %v3468_v5 }
 0x5b1   :  { %3164 = vmatpush1.bf16.msra.mxu0 %v3902_v10  ;;  %3191 = vmatpush3.bf16.msra.mxu1 %v3904_v11 }
 0x5b2   :  { %3166 = vmatprep.subr.bf16.mxu0 %v3907_v39  ;;  %3192 = vmatprep.subr.bf16.mxu1 %v3468_v5 }
 0x5b5   :  { %3168 = vmatpush1.bf16.msra.mxu0 %v3910_v57  ;;  %3194 = vmatpush3.bf16.msra.mxu1 %v3914_v2 }
 0x5b6   :  { %3170 = vmatprep.subr.bf16.mxu0 %v3916_v4  ;;  %3195 = vmatprep.subr.bf16.mxu1 %v3468_v5 }
 0x5b9   :  { %3172 = vmatpush1.bf16.msra.mxu0 %v3920_v26  ;;  %3197 = vmatpush3.bf16.msra.mxu1 %v3924_v31 }
 0x5ba   :  { %3174 = vmatprep.subr.bf16.mxu0 %v3926_v34  ;;  %3198 = vmatprep.subr.bf16.mxu1 %v3468_v5 }
 0x5bd   :  { %3176 = vmatpush1.bf16.msra.mxu0 %v3930_v21  ;;  %3200 = vmatpush3.bf16.msra.mxu1 %v3934_v24 }
 0x5be   :  { %3202 = vmatprep.subr.bf16.mxu0 %v3872_v27  ;;  %3233 = vmatprep.subr.bf16.mxu1 %v3468_v5  ;;  %v1633_v27 = vld [vmem:[%s4114_s5] sm:$0x1] }
 0x673   :  { %v1541_v3 = vpop.f32.mrb[12].mxu0  ;;  %v1612_v7 = vpop.f32.mrb[12].mxu1 }
 0x674   :  { %v1616_v9 = vadd.f32 %v1541_v3, %v1426_v0  ;;  %v1543_v12 = vpop.f32.mrb[13].mxu0  ;;  %v2647_v30 = vpop.f32.mrb[13].mxu1  ;;  %v1634_v16 = vadd.f32 %v1633_v27, %v1612_v7  ;;  %v2093_v0 = vld [vmem:[#allocation11 + $0x48] sm:$0xff]  ;;  %v2094_v7 = vld [vmem:[#allocation11 + $0x50] sm:$0xff] }
 0x675   :  { %v1626_v42 = vadd.f32 %v1624_v20, %v1543_v12  ;;  %v2096_v12 = vld [vmem:[#allocation11 + $0x60] sm:$0xff] }
 0x676   :  { %v2226_v33 = vmul.f32 -1.442695, %v1616_v9  ;;  %v2095_v9 = vld [vmem:[#allocation11 + $0x58] sm:$0xff] }
 0x677   :  { %v2227_v51 = vmul.f32 -1.442695, %v1626_v42  ;;  %v3273_v30 = vpack.c.bf16 %v2095_v9, %v2094_v7  ;;  %v2098_v42 = vld [vmem:[#allocation11 + $0x70] sm:$0xff] }
 0x678   :  { %3342 = vpow2.f32 %v2226_v33  ;;  %v2097_v33 = vld [vmem:[#allocation11 + $0x68] sm:$0xff] }
 0x679   :  { %3344 = vpow2.f32 %v2227_v51  ;;  %v3276_v20 = vpack.c.bf16 %v2097_v33, %v2096_v12  ;;  %v2099_v51 = vld [vmem:[#allocation11 + $0x78] sm:$0xff] }
 0x682   :  { %v3343_v59 = vpop.eup %3342 }
 0x683   :  { %v1620_v6 = vadd.f32 1.0, %v3343_v59  ;;  %v3345_v13 = vpop.eup %3344  ;;  %v3279_v59 = vpack.c.bf16 %v2099_v51, %v2098_v42 }
 0x684   :  { %v1630_v18 = vadd.f32 1.0, %v3345_v13 }
 0x685   :  { %3346 = vrcp.f32 %v1620_v6  ;;  %v1864_v6 = vld [vmem:[#allocation3 + $0x7] ss:$8 sm:$0x7] }
 0x68f   :  { %v3347_v22 = vpop.eup %3346 }
 0x690   :  { %v1635_v14 = vmul.f32 %v3347_v22, %v1634_v16 }
 0x692   :  { %v1638_v17 = vadd.f32 %v1636_v25, %v1635_v14 }
 0x694   :  { %3348 = vtanh.f32 %v1638_v17  ;;  %v2062_v17 = vrot.slane %v1864_v6, 1 }
 0x695   :  { %3350 = vrcp.f32 %v1630_v18 }
 0x69e   :  { %v3349_v19 = vpop.eup %3348 }
 0x69f   :  { %v1640_v32 = vsub.f32 %v3995_v63, %v3349_v19  ;;  %v3351_v28 = vpop.eup %3350  ;;  %v2092_v63 = vld [vmem:[#allocation11 + $0x40] sm:$0xff] }
 0x6a0   :  { %v3270_v3 = vpack.c.bf16 %v2093_v0, %v2092_v63 }
 0x6a1   :  { %v1641_v36 = vmul.f32 %v3351_v28, %v1640_v32 }
 0x6a3   :  { %v4039_v41 = vadd.f32 %v3349_v19, %v1641_v36 }
 0x6a5   :  { %1643 = vst [vmem:[#allocation4 + $0x5] sm:$0x1] %v4039_v41  ;;  %1759 = vmatmul.mubr.f32.vlgmr.msra.gmra.mrb[14].mxu0 %v4039_v41  ;;  %2681 = vmatmul.mubr.f32.vlgmr.msra.gmra.mrb[14].mxu1 %v4039_v41 }
 0x6a6   :  { %3204 = vmatpush1.bf16.msra.mxu0 %v3874_v29  ;;  %3235 = vmatpush3.bf16.msra.mxu1 %v3969_v48  ;;  %v1645_v29 = vld [vmem:[#allocation3 + $0x6] ss:$8 sm:$0x7] }
 0x6a7   :  { %3206 = vmatprep.subr.bf16.mxu0 %v3878_v37  ;;  %3236 = vmatprep.subr.bf16.mxu1 %v3468_v5 }
 0x6a8   :  { %1977 = vmatprep.mubr.f32.mxu0 %v3469_v8  ;;  %2715 = vmatprep.mubr.msk.f32.mxu1 %vm3470_vm0, %v3469_v8 }
 0x6aa   :  { %3208 = vmatpush1.bf16.msra.mxu0 %v3880_v40  ;;  %3238 = vmatpush3.bf16.msra.mxu1 %v3973_v60 }
 0x6ab   :  { %3210 = vmatprep.subr.bf16.mxu0 %v3884_v44  ;;  %3239 = vmatprep.subr.bf16.mxu1 %v3468_v5 }
 0x6ae   :  { %3212 = vmatpush1.bf16.msra.mxu0 %v3886_v47  ;;  %3241 = vmatpush3.bf16.msra.mxu1 %v3977_v15 }
 0x6af   :  { %3214 = vmatprep.subr.bf16.mxu0 %v3890_v53  ;;  %3242 = vmatprep.subr.bf16.mxu1 %v3468_v5 }
 0x6b2   :  { %3216 = vmatpush1.bf16.msra.mxu0 %v3892_v23  ;;  %3244 = vmatpush3.bf16.msra.mxu1 %v3895_v61  ;;  %v1843_v61 = vrot.slane %v1645_v29, 1 }
 0x6b3   :  { %3218 = vmatprep.subr.bf16.mxu0 %v3899_v1  ;;  %3245 = vmatprep.subr.bf16.mxu1 %v3468_v5 }
 0x6b6   :  { %3220 = vmatpush1.bf16.msra.mxu0 %v3902_v10  ;;  %3247 = vmatpush3.bf16.msra.mxu1 %v3904_v11 }
 0x6b7   :  { %3222 = vmatprep.subr.bf16.mxu0 %v3907_v39  ;;  %3248 = vmatprep.subr.bf16.mxu1 %v3468_v5 }
 0x6ba   :  { %3224 = vmatpush1.bf16.msra.mxu0 %v3910_v57  ;;  %3250 = vmatpush3.bf16.msra.mxu1 %v3914_v2  ;;  %v1852_v57 = vld [vmem:[%s4114_s5] sm:$0x1] }
 0x6bb   :  { %3226 = vmatprep.subr.bf16.mxu0 %v3916_v4  ;;  %3251 = vmatprep.subr.bf16.mxu1 %v3468_v5 }
 0x6be   :  { %3228 = vmatpush1.bf16.msra.mxu0 %v3920_v26  ;;  %3253 = vmatpush3.bf16.msra.mxu1 %v3924_v31  ;;  %v1855_v31 = vrot.slane %v1645_v29, 2 }
 0x6bf   :  { %3230 = vmatprep.subr.bf16.mxu0 %v3926_v34  ;;  %3254 = vmatprep.subr.bf16.mxu1 %v3468_v5 }
 0x6c2   :  { %3232 = vmatpush1.bf16.msra.mxu0 %v3930_v21  ;;  %3256 = vmatpush3.bf16.msra.mxu1 %v3934_v24 }
 0x6c3   :  { %3257 = vmatprep.subr.bf16.mxu0 %v3468_v5 }
 0x778   :  { %v1760_v37 = vpop.f32.mrb[14].mxu0  ;;  %v1831_v40 = vpop.f32.mrb[14].mxu1 }
 0x779   :  { %v1835_v44 = vadd.f32 %v1760_v37, %v1645_v29  ;;  %v1762_v47 = vpop.f32.mrb[15].mxu0  ;;  %v2682_v53 = vpop.f32.mrb[15].mxu1  ;;  %v1853_v4 = vadd.f32 %v1852_v57, %v1831_v40  ;;  %v2074_v37 = vrot.slane %v1864_v6, 2 }
 0x77a   :  { %v1845_v1 = vadd.f32 %v1843_v61, %v1762_v47 }
 0x77b   :  { %v2228_v23 = vmul.f32 -1.442695, %v1835_v44 }
 0x77c   :  { %v2229_v10 = vmul.f32 -1.442695, %v1845_v1 }
 0x77d   :  { %3352 = vpow2.f32 %v2228_v23 }
 0x77e   :  { %3354 = vpow2.f32 %v2229_v10 }
 0x787   :  { %v3353_v11 = vpop.eup %3352 }
 0x788   :  { %v1839_v39 = vadd.f32 1.0, %v3353_v11  ;;  %v3355_v2 = vpop.eup %3354 }
 0x789   :  { %v1849_v24 = vadd.f32 1.0, %v3355_v2 }
 0x78a   :  { %3356 = vrcp.f32 %v1839_v39  ;;  %v2232_v39 = vld [vmem:[%s4116_s7] ss:$0 sm:$0xff] }
 0x794   :  { %v3357_v26 = vpop.eup %3356 }
 0x795   :  { %v1854_v34 = vmul.f32 %v3357_v26, %v1853_v4 }
 0x797   :  { %v1857_v21 = vadd.f32 %v1855_v31, %v1854_v34 }
 0x799   :  { %3358 = vtanh.f32 %v1857_v21 }
 0x79a   :  { %3360 = vrcp.f32 %v1849_v24 }
 0x7a3   :  { %v3359_v48 = vpop.eup %3358 }
 0x7a4   :  { %v1859_v60 = vsub.f32 %v4039_v41, %v3359_v48  ;;  %v3361_v15 = vpop.eup %3360 }
 0x7a6   :  { %v1860_v38 = vmul.f32 %v3361_v15, %v1859_v60 }
 0x7a8   :  { %v4082_v50 = vadd.f32 %v3359_v48, %v1860_v38 }
 0x7aa   :  { %1862 = vst [vmem:[#allocation4 + $0x6] sm:$0x1] %v4082_v50  ;;  %1978 = vmatmul.mubr.f32.vlgmr.msra.gmra.mrb[16].mxu0 %v4082_v50  ;;  %2716 = vmatmul.mubr.f32.vlgmr.msra.gmra.mrb[16].mxu1 %v4082_v50 }
 0x7ab   :  { %2750 = vmatprep.mubr.msk.f32.mxu0 %vm3470_vm0, %v3469_v8  ;;  %3259 = vmatpush3.bf16.msra.mxu0 %v3258_v45  ;;  %v2091_v8 = vld [vmem:[#allocation11 + $0x38] sm:$0xff] }
 0x7ac   :  { %3260 = vmatprep.subr.bf16.mxu0 %v3468_v5  ;;  %v3267_v62 = vpack.c.bf16 %v2091_v8, %v2090_v58 }
 0x7af   :  { %3262 = vmatpush3.bf16.msra.mxu0 %v3261_v52 }
 0x7b0   :  { %3263 = vmatprep.subr.bf16.mxu0 %v3468_v5 }
 0x7b3   :  { %3265 = vmatpush3.bf16.msra.mxu0 %v3264_v56 }
 0x7b4   :  { %3266 = vmatprep.subr.bf16.mxu0 %v3468_v5 }
 0x7b7   :  { %3268 = vmatpush3.bf16.msra.mxu0 %v3267_v62 }
 0x7b8   :  { %3269 = vmatprep.subr.bf16.mxu0 %v3468_v5 }
 0x7bb   :  { %3271 = vmatpush3.bf16.msra.mxu0 %v3270_v3 }
 0x7bc   :  { %3272 = vmatprep.subr.bf16.mxu0 %v3468_v5 }
 0x7bf   :  { %3274 = vmatpush3.bf16.msra.mxu0 %v3273_v30 }
 0x7c0   :  { %3275 = vmatprep.subr.bf16.mxu0 %v3468_v5 }
 0x7c3   :  { %3277 = vmatpush3.bf16.msra.mxu0 %v3276_v20 }
 0x7c4   :  { %3278 = vmatprep.subr.bf16.mxu0 %v3468_v5  ;;  %v2071_v5 = vld [vmem:[%s4114_s5] sm:$0x1] }
 0x7c7   :  { %3280 = vmatpush3.bf16.msra.mxu0 %v3279_v59 }
 0x87d   :  { %v1979_v27 = vpop.f32.mrb[16].mxu0  ;;  %v2050_v13 = vpop.f32.mrb[16].mxu1 }
 0x87e   :  { %v2054_v16 = vadd.f32 %v1979_v27, %v1864_v6  ;;  %v1981_v22 = vpop.f32.mrb[17].mxu0  ;;  %v2717_v25 = vpop.f32.mrb[17].mxu1  ;;  %v2072_v41 = vadd.f32 %v2071_v5, %v2050_v13 }
 0x87f   :  { %v2064_v18 = vadd.f32 %v2062_v17, %v1981_v22 }
 0x880   :  { %v2230_v14 = vmul.f32 -1.442695, %v2054_v16 }
 0x881   :  { %v2231_v19 = vmul.f32 -1.442695, %v2064_v18 }
 0x882   :  { %3362 = vpow2.f32 %v2230_v14 }
 0x883   :  { %3364 = vpow2.f32 %v2231_v19 }
 0x88c   :  { %v3363_v32 = vpop.eup %3362 }
 0x88d   :  { %v2058_v28 = vadd.f32 1.0, %v3363_v32  ;;  %v3365_v36 = vpop.eup %3364 }
 0x88e   :  { %v2068_v47 = vadd.f32 1.0, %v3365_v36 }
 0x88f   :  { %3366 = vrcp.f32 %v2058_v28 }
 0x899   :  { %v3367_v29 = vpop.eup %3366 }
 0x89a   :  { %v2073_v40 = vmul.f32 %v3367_v29, %v2072_v41 }
 0x89c   :  { %v2076_v44 = vadd.f32 %v2074_v37, %v2073_v40 }
 0x89e   :  { %3368 = vtanh.f32 %v2076_v44 }
 0x89f   :  { %3370 = vrcp.f32 %v2068_v47 }
 0x8a8   :  { %v3369_v53 = vpop.eup %3368 }
 0x8a9   :  { %v2078_v23 = vsub.f32 %v4082_v50, %v3369_v53  ;;  %v3371_v61 = vpop.eup %3370 }
 0x8ab   :  { %v2079_v1 = vmul.f32 %v3371_v61, %v2078_v23 }
 0x8ad   :  { %v2080_v10 = vadd.f32 %v3369_v53, %v2079_v1 }
 0x8af   :  { %2081 = vst [vmem:[#allocation4 + $0x7] sm:$0x1] %v2080_v10  ;;  %2082 = vst [vmem:[%s4119_s10] sm:$0x1] %v2080_v10 }
 0x8b6   :  { %v2083_v11 = vld [vmem:[#allocation4] sm:$0xff] }
 0x8b7   :  { %2751 = vmatmul.mubr.f32.vlgmr.msra.gmra.mrb[18].mxu0 %v2083_v11 }
 0x98a   :  { %v2173_v57 = vpop.f32.mrb[18].mxu0 }
 0x98b   :  { %v2174_v2 = vadd.f32 %v2232_v39, %v2173_v57  ;;  %v2752_v4 = vpop.f32.mrb[19].mxu0 }
 0x98d   :  { %2177 = vmax.xlane.f32.xlu0 %v2174_v2 }
 0xa1a   :  { %v2178_v26 = vpop.xlane.xlu0 %2177 }
 0xa1b   :  { %v2179_v31 = vsub.f32 %v2174_v2, %v2178_v26 }
 0xa1d   :  { %v2180_v34 = vmul.f32 1.442695, %v2179_v31 }
 0xa1f   :  { %3372 = vpow2.f32 %v2180_v34 }
 0xa29   :  { %v3373_v21 = vpop.eup %3372 }
 0xa2a   :  { %2182 = vadd.xlane.f32.xlu0 %v3373_v21 }
 0xab7   :  { %v2183_v24 = vpop.xlane.xlu0 %2182 }
 0xab8   :  { %3374 = vrcp.f32 %v2183_v24 }
 0xac2   :  { %v3375_v48 = vpop.eup %3374 }
 0xac3   :  { %v2185_v60 = vmul.f32 %v3375_v48, %v2183_v24 }
 0xac5   :  { %v2186_v15 = vsub.f32 2.0, %v2185_v60 }
 0xac7   :  { %v2187_v38 = vmul.f32 %v3375_v48, %v2186_v15 }
 0xac9   :  { %v2188_v50 = vmul.f32 %v3373_v21, %v2187_v38 }
 0xacb   :  { %2189 = vst [vmem:[%s4118_s9] sm:$0xff] %v2188_v50 }
 0xacc   :  { %2198 = vsyncpa [#allocation6], 1 }
 0xacd   :  { %2199 = vsyncpa [#allocation10], 1 }
 0xace   :  { %2200 = vsyncpa [#allocation7], 1 }

</bundles_post_ra>
